<compile_context>
chip_gen: v7x
topology: tpu7x:2x2x1
jax: 0.10.0
libtpu: 0.0.40
codegen_flags: <defaults>
</compile_context>

<pallas_src>
import math
import jax
import jax.numpy as jnp
from jax import lax
from jax.experimental import pallas as pl
from jax.experimental.pallas import tpu as pltpu

HEADS = 4
GELU_C = math.sqrt(2.0 / math.pi)
LN_EPS = 1e-12

# Rows of the packed per-block vector slab (shape (num_blocks, 8, 4*D), f32,
# each row zero-padded to 4*D lanes).
ROW_LN1_W, ROW_LN1_B, ROW_BO, ROW_LN2_W, ROW_LN2_B, ROW_B2, ROW_BQKV, ROW_B1 = range(8)


def _layernorm(x, w, b):
    # TF-style LayerNorm (epsilon inside the sqrt), matches the reference LayerNorm.
    u = jnp.mean(x, axis=-1, keepdims=True)
    s = jnp.mean((x - u) ** 2, axis=-1, keepdims=True)
    xn = (x - u) * lax.rsqrt(s + LN_EPS)
    return w * xn + b


def transformer_blocks_kernel(x_ref, bias_ref, wqkv_ref, wo_ref, w1_ref, w2_ref,
                              vecs_ref, o_ref, ctx_scratch):
    l = pl.program_id(1)                      # transformer-block index (carry axis)

    # First block for this batch tile: seed the VMEM-resident carry from the input.
    @pl.when(l == 0)
    def _():
        o_ref[...] = x_ref[...]

    x3 = o_ref[...]                           # (Bt, S, D) f32, resident across blocks
    Bt, S, D = x3.shape
    dh = D // HEADS
    scale = jnp.float32(1.0 / math.sqrt(dh))
    M = Bt * S
    x2 = x3.reshape(M, D)                     # flatten batch*seq for big-M matmuls

    vecs = vecs_ref[0]                        # (8, 4D) f32, all per-block vectors
    ln1_w = vecs[ROW_LN1_W:ROW_LN1_W + 1, :D]
    ln1_b = vecs[ROW_LN1_B:ROW_LN1_B + 1, :D]
    bo    = vecs[ROW_BO:ROW_BO + 1, :D]
    ln2_w = vecs[ROW_LN2_W:ROW_LN2_W + 1, :D]
    ln2_b = vecs[ROW_LN2_B:ROW_LN2_B + 1, :D]
    b2    = vecs[ROW_B2:ROW_B2 + 1, :D]
    bqkv  = vecs[ROW_BQKV:ROW_BQKV + 1, :3 * D]
    b1    = vecs[ROW_B1:ROW_B1 + 1, :]

    # ---------------- attention sublayer (pre-norm + residual) ----------------
    xn = _layernorm(x2, ln1_w, ln1_b)
    # Fused Q/K/V projection: one (M,D)x(D,3D) MXU matmul.
    qkv = jnp.dot(xn.astype(jnp.bfloat16), wqkv_ref[0],
                  preferred_element_type=jnp.float32) + bqkv            # (M, 3D)
    qkv3 = qkv.reshape(Bt, S, 3 * D).astype(jnp.bfloat16)

    bias = bias_ref[...]                       # (Bt, S, 1) additive: 0 or -1e9

    for h in range(HEADS):                     # static 4-head loop
        qh = qkv3[:, :, h * dh:(h + 1) * dh]
        kh = qkv3[:, :, D + h * dh:D + (h + 1) * dh]
        vh = qkv3[:, :, 2 * D + h * dh:2 * D + (h + 1) * dh]
        sc = jnp.einsum('bqd,bkd->bqk', qh, kh,
                        preferred_element_type=jnp.float32) * scale + bias  # (Bt,S,S)
        sc = sc - jnp.max(sc, axis=-1, keepdims=True)
        e = jnp.exp(sc)
        p = e * pl.reciprocal(jnp.sum(e, axis=-1, keepdims=True), approx=True)
        # Write this head's context into its lane slot; one full-K wo matmul later.
        ctx_scratch[:, :, h * dh:(h + 1) * dh] = jnp.einsum(
            'bqk,bkd->bqd', p.astype(jnp.bfloat16), vh,
            preferred_element_type=jnp.float32)

    ctx = ctx_scratch[...].reshape(M, D).astype(jnp.bfloat16)
    attn = jnp.dot(ctx, wo_ref[0], preferred_element_type=jnp.float32) + bo
    x2 = x2 + attn
    # TODO(synk): nn.Dropout is stochastic; treated as identity (eval mode / p=0).

    # ---------------- feed-forward sublayer (pre-norm + residual) -------------
    xn2 = _layernorm(x2, ln2_w, ln2_b).astype(jnp.bfloat16)
    h1 = jnp.dot(xn2, w1_ref[0], preferred_element_type=jnp.float32) + b1   # (M, 4D)
    act = 0.5 * h1 * (1.0 + jnp.tanh(GELU_C * (h1 + 0.044715 * (h1 * h1 * h1))))
    h2 = jnp.dot(act.astype(jnp.bfloat16), w2_ref[0],
                 preferred_element_type=jnp.float32) + b2                   # (M, D)
    x2 = x2 + h2

    o_ref[...] = x2.reshape(Bt, S, D)


def build_packed_params(params, D):
    """Pack per-block parameter dicts into 5 stacked tensors:
       wqkv (L,D,3D) bf16, wo (L,D,D) bf16, w1 (L,D,4D) bf16, w2 (L,4D,D) bf16,
       vecs (L,8,4D) f32 holding every bias / LayerNorm vector (zero-padded rows)."""
    wqkv = jnp.stack([jnp.concatenate([p['wq'], p['wk'], p['wv']], axis=1)
                      for p in params]).astype(jnp.bfloat16)
    wo = jnp.stack([p['wo'] for p in params]).astype(jnp.bfloat16)
    w1 = jnp.stack([p['w1'] for p in params]).astype(jnp.bfloat16)
    w2 = jnp.stack([p['w2'] for p in params]).astype(jnp.bfloat16)

    def pack_vecs(p):
        def row(v):
            v = v.reshape(-1).astype(jnp.float32)
            return jnp.pad(v, (0, 4 * D - v.shape[0]))
        bqkv = jnp.concatenate([p['bq'].reshape(-1), p['bk'].reshape(-1),
                                p['bv'].reshape(-1)])
        rows = [p['ln1_w'], p['ln1_b'], p['bo'], p['ln2_w'], p['ln2_b'],
                p['b2'], bqkv, p['b1']]
        return jnp.stack([row(r) for r in rows], axis=0)      # (8, 4D)

    vecs = jnp.stack([pack_vecs(p) for p in params])          # (L, 8, 4D)
    return wqkv, wo, w1, w2, vecs


def _vmem_limit_bytes():
    """Generation-aware VMEM limit: ~3/4 of physical capacity, capped at 100 MiB.
    v5e/v6e (128 MiB) -> ~96 MiB; v7x (64 MiB per TC) -> 48 MiB."""
    cap = 128 * 1024 * 1024
    try:
        cap = int(pltpu.get_tpu_info().vmem_capacity_bytes)
    except Exception:
        pass
    return max(min((cap * 3) // 4, 100 * 1024 * 1024), 16 * 1024 * 1024)


def _pick_batch_tile(B, S, D, vmem_limit, param_bytes_per_block):
    """Largest divisor of B whose live intermediates fit the same VMEM limit the
    compiler is given (double-buffered params + in/out blocks + activation temps).
    NOTE(v7x): with 2 TensorCores per chip, pass batch_tile<=B//2 explicitly if you
    want the 'parallel' batch axis to feed both cores."""
    budget = max(vmem_limit - 2 * param_bytes_per_block - (2 << 20), 1 << 20)

    def tile_bytes(bt):
        m = bt * S
        hidden_io = 4 * bt * S * D * 4          # dbl-buffered input + output block
        act = 8 * m * D * 4                     # x2 / xn / attn / residual temps
        qkv = m * 3 * D * (4 + 2)               # f32 result + bf16 copy
        scores = 6 * bt * S * S * 4             # unrolled-head (Bt,S,S) temps
        ctx = m * D * (4 + 2)                   # ctx scratch + bf16 copy
        ffn = m * 4 * D * (4 + 4 + 2)           # h1 f32, act f32, act bf16
        return hidden_io + act + qkv + scores + ctx + ffn

    for bt in range(B, 0, -1):
        if B % bt == 0 and tile_bytes(bt) <= budget:
            return bt
    return 1


def transformer_rep_forward(hidden, mask, params, batch_tile=None):
    """Equivalent of Transformer_rep.forward: all TransformerBlocks fused into one
    pallas_call; hidden stays VMEM-resident across blocks."""
    B, S, D = hidden.shape
    L = len(params)
    x = hidden.astype(jnp.float32)
    # Additive query-axis mask bias: -1e9 on masked query rows (broadcast over keys).
    bias = jnp.where(mask == 0, jnp.float32(-1e9), jnp.float32(0.0)).reshape(B, S, 1)

    wqkv, wo, w1, w2, vecs = build_packed_params(params, D)

    vmem_limit = _vmem_limit_bytes()
    param_bytes_per_block = sum(int(a.size) * a.dtype.itemsize
                                for a in (wqkv, wo, w1, w2, vecs)) // L
    Bt = batch_tile if batch_tile is not None else _pick_batch_tile(
        B, S, D, vmem_limit, param_bytes_per_block)
    assert B % Bt == 0
    grid = (B // Bt, L)

    def pspec(arr):
        blk = (1,) + arr.shape[1:]
        nd = len(blk)
        return pl.BlockSpec(blk, lambda bi, l, _nd=nd: (l,) + (0,) * (_nd - 1))

    in_specs = [
        pl.BlockSpec((Bt, S, D), lambda bi, l: (bi, 0, 0)),   # hidden (read at l==0)
        pl.BlockSpec((Bt, S, 1), lambda bi, l: (bi, 0, 0)),   # additive mask bias
        pspec(wqkv), pspec(wo), pspec(w1), pspec(w2), pspec(vecs),
    ]

    return pl.pallas_call(
        transformer_blocks_kernel,
        out_shape=jax.ShapeDtypeStruct((B, S, D), jnp.float32),
        grid=grid,
        in_specs=in_specs,
        out_specs=pl.BlockSpec((Bt, S, D), lambda bi, l: (bi, 0, 0)),
        scratch_shapes=[pltpu.VMEM((Bt, S, D), jnp.float32)],   # per-head ctx slab
        compiler_params=pltpu.CompilerParams(
            dimension_semantics=("parallel", "arbitrary"),
            vmem_limit_bytes=int(vmem_limit)),
    )(x, bias, wqkv, wo, w1, w2, vecs)


def _xavier_normal(key, shape):
    fan_in, fan_out = shape[0], shape[1]
    std = math.sqrt(2.0 / (fan_in + fan_out))
    return (std * jax.random.normal(key, shape)).astype(jnp.float32)


def init_block_params(key, D):
    """Deterministic per-block params. Linear weights stored pre-transposed
    (in, out) so the kernel computes y = x @ W + b (PyTorch uses x @ W^T + b)."""
    ks = jax.random.split(key, 6)
    z = lambda *s: jnp.zeros(s, jnp.float32)
    o = lambda *s: jnp.ones(s, jnp.float32)
    return {
        'ln1_w': o(1, D), 'ln1_b': z(1, D),
        'wq': _xavier_normal(ks[0], (D, D)), 'bq': z(1, D),
        'wk': _xavier_normal(ks[1], (D, D)), 'bk': z(1, D),
        'wv': _xavier_normal(ks[2], (D, D)), 'bv': z(1, D),
        'wo': _xavier_normal(ks[3], (D, D)), 'bo': z(1, D),
        'ln2_w': o(1, D), 'ln2_b': z(1, D),
        'w1': _xavier_normal(ks[4], (D, 4 * D)), 'b1': z(1, 4 * D),
        'w2': _xavier_normal(ks[5], (4 * D, D)), 'b2': z(1, D),
    }


if __name__ == "__main__":
    B, S, D = 2, 8, 32          # batch, sequence, hidden_size (hidden % heads == 0)
    N_BLOCKS = 2                # args.num_blocks

    key = jax.random.PRNGKey(0)
    k_x, k_p = jax.random.split(key)
    hidden = jax.random.normal(k_x, (B, S, D), dtype=jnp.float32)
    # mask: 1 = valid, 0 = masked (last two query positions masked, as an example)
    mask = jnp.ones((B, S), jnp.int32).at[:, -2:].set(0)

    block_keys = jax.random.split(k_p, N_BLOCKS)
    params = [init_block_params(bk, D) for bk in block_keys]

    out = transformer_rep_forward(hidden, mask, params)
    jax.block_until_ready(out)
    assert out.shape == (B, S, D)
    assert bool(jnp.isfinite(out).all())
    print("KERNEL_OK")
</pallas_src>

<mosaic_0001>
module attributes {stable_mosaic.version = 11 : i64} {
  func.func @transformer_blocks_kernel(%arg0: i32, %arg1: i32, %arg2: memref<2x8x32xf32, #tpu.memory_space<vmem>>, %arg3: memref<2x8x1xf32, #tpu.memory_space<vmem>>, %arg4: memref<1x32x96xbf16, #tpu.memory_space<vmem>>, %arg5: memref<1x32x32xbf16, #tpu.memory_space<vmem>>, %arg6: memref<1x32x128xbf16, #tpu.memory_space<vmem>>, %arg7: memref<1x128x32xbf16, #tpu.memory_space<vmem>>, %arg8: memref<1x8x128xf32, #tpu.memory_space<vmem>>, %arg9: memref<2x8x32xf32, #tpu.memory_space<vmem>>, %arg10: memref<2x8x32xf32, #tpu.memory_space<vmem>>) attributes {dimension_semantics = [#tpu.dimension_semantics<parallel>, #tpu.dimension_semantics<arbitrary>], iteration_bounds = array<i64: 1, 2>, scalar_prefetch = 0 : i64, scratch_operands = 1 : i64, tpu.core_type = #tpu.core_type<tc>, window_params = [{transform_indices = @transform_0, window_bounds = array<i64: 2, 8, 32>}, {transform_indices = @transform_1, window_bounds = array<i64: 2, 8, 1>}, {transform_indices = @transform_2, window_bounds = array<i64: 1, 32, 96>}, {transform_indices = @transform_3, window_bounds = array<i64: 1, 32, 32>}, {transform_indices = @transform_4, window_bounds = array<i64: 1, 32, 128>}, {transform_indices = @transform_5, window_bounds = array<i64: 1, 128, 32>}, {transform_indices = @transform_6, window_bounds = array<i64: 1, 8, 128>}, {transform_indices = @transform_7, window_bounds = array<i64: 2, 8, 32>}]} {
    %c0_i32 = arith.constant 0 : i32
    %0 = arith.cmpi eq, %arg1, %c0_i32 : i32
    %1 = arith.extui %0 : i1 to i32
    %c0_i32_0 = arith.constant 0 : i32
    %2 = arith.cmpi ne, %1, %c0_i32_0 : i32
    scf.if %2 {
      %c0_73 = arith.constant 0 : index
      %c0_74 = arith.constant 0 : index
      %c0_75 = arith.constant 0 : index
      %189 = vector.load %arg2[%c0_73, %c0_74, %c0_75] : memref<2x8x32xf32, #tpu.memory_space<vmem>>, vector<2x8x32xf32>
      %c0_76 = arith.constant 0 : index
      %c0_77 = arith.constant 0 : index
      %c0_78 = arith.constant 0 : index
      %190 = vector.load %arg9[%c0_76, %c0_77, %c0_78] : memref<2x8x32xf32, #tpu.memory_space<vmem>>, vector<2x8x32xf32>
      tpu.vector_store %arg9[%c0_76, %c0_77, %c0_78], %189 {strides = array<i32>} : memref<2x8x32xf32, #tpu.memory_space<vmem>>, vector<2x8x32xf32>,
    } else {
    }
    %c0 = arith.constant 0 : index
    %c0_1 = arith.constant 0 : index
    %c0_2 = arith.constant 0 : index
    %3 = vector.load %arg9[%c0, %c0_1, %c0_2] : memref<2x8x32xf32, #tpu.memory_space<vmem>>, vector<2x8x32xf32>
    %4 = vector.shape_cast %3 : vector<2x8x32xf32> to vector<16x32xf32>
    %c0_3 = arith.constant 0 : index
    %c0_4 = arith.constant 0 : index
    %c0_5 = arith.constant 0 : index
    %5 = vector.load %arg8[%c0_3, %c0_4, %c0_5] : memref<1x8x128xf32, #tpu.memory_space<vmem>>, vector<1x8x128xf32>
    %6 = vector.shape_cast %5 : vector<1x8x128xf32> to vector<8x128xf32>
    %7 = vector.extract_strided_slice %6 {offsets = [0, 0], sizes = [1, 32], strides = [1, 1]} : vector<8x128xf32> to vector<1x32xf32>
    %8 = vector.extract_strided_slice %6 {offsets = [1, 0], sizes = [1, 32], strides = [1, 1]} : vector<8x128xf32> to vector<1x32xf32>
    %9 = vector.extract_strided_slice %6 {offsets = [2, 0], sizes = [1, 32], strides = [1, 1]} : vector<8x128xf32> to vector<1x32xf32>
    %10 = vector.extract_strided_slice %6 {offsets = [3, 0], sizes = [1, 32], strides = [1, 1]} : vector<8x128xf32> to vector<1x32xf32>
    %11 = vector.extract_strided_slice %6 {offsets = [4, 0], sizes = [1, 32], strides = [1, 1]} : vector<8x128xf32> to vector<1x32xf32>
    %12 = vector.extract_strided_slice %6 {offsets = [5, 0], sizes = [1, 32], strides = [1, 1]} : vector<8x128xf32> to vector<1x32xf32>
    %13 = vector.extract_strided_slice %6 {offsets = [6, 0], sizes = [1, 96], strides = [1, 1]} : vector<8x128xf32> to vector<1x96xf32>
    %14 = vector.extract_strided_slice %6 {offsets = [7, 0], sizes = [1, 128], strides = [1, 1]} : vector<8x128xf32> to vector<1x128xf32>
    %cst = arith.constant dense<0.000000e+00> : vector<16xf32>
    %15 = vector.multi_reduction <add>, %4, %cst [1] : vector<16x32xf32> to vector<16xf32>
    %16 = vector.shape_cast %15 : vector<16xf32> to vector<16x1xf32>
    %cst_6 = arith.constant 3.200000e+01 : f32
    %17 = vector.broadcast %cst_6 : f32 to vector<16x1xf32>
    %18 = arith.divf %16, %17 : vector<16x1xf32>
    %19 = vector.broadcast %18 : vector<16x1xf32> to vector<16x32xf32>
    %20 = arith.subf %4, %19 : vector<16x32xf32>
    %21 = arith.mulf %20, %20 : vector<16x32xf32>
    %cst_7 = arith.constant dense<0.000000e+00> : vector<16xf32>
    %22 = vector.multi_reduction <add>, %21, %cst_7 [1] : vector<16x32xf32> to vector<16xf32>
    %23 = vector.shape_cast %22 : vector<16xf32> to vector<16x1xf32>
    %cst_8 = arith.constant 3.200000e+01 : f32
    %24 = vector.broadcast %cst_8 : f32 to vector<16x1xf32>
    %25 = arith.divf %23, %24 : vector<16x1xf32>
    %26 = vector.broadcast %18 : vector<16x1xf32> to vector<16x32xf32>
    %27 = arith.subf %4, %26 : vector<16x32xf32>
    %cst_9 = arith.constant 9.99999996E-13 : f32
    %28 = vector.broadcast %cst_9 : f32 to vector<16x1xf32>
    %29 = arith.addf %25, %28 : vector<16x1xf32>
    %30 = math.rsqrt %29 : vector<16x1xf32>
    %31 = vector.broadcast %30 : vector<16x1xf32> to vector<16x32xf32>
    %32 = arith.mulf %27, %31 : vector<16x32xf32>
    %33 = vector.broadcast %7 : vector<1x32xf32> to vector<16x32xf32>
    %34 = arith.mulf %33, %32 : vector<16x32xf32>
    %35 = vector.broadcast %8 : vector<1x32xf32> to vector<16x32xf32>
    %36 = arith.addf %34, %35 : vector<16x32xf32>
    %37 = arith.truncf %36 : vector<16x32xf32> to vector<16x32xbf16>
    %c0_10 = arith.constant 0 : index
    %c0_11 = arith.constant 0 : index
    %c0_12 = arith.constant 0 : index
    %38 = vector.load %arg4[%c0_10, %c0_11, %c0_12] : memref<1x32x96xbf16, #tpu.memory_space<vmem>>, vector<1x32x96xbf16>
    %39 = vector.shape_cast %38 : vector<1x32x96xbf16> to vector<32x96xbf16>
    %cst_13 = arith.constant dense<0.000000e+00> : vector<16x96xf32>
    %40 = tpu.matmul %37, %39, %cst_13 {dimension_numbers = #tpu.dot_dimension_numbers<[1], [0], [0], [1], [0, 0, 1, 1], [], []>} : vector<16x32xbf16>, vector<32x96xbf16>, vector<16x96xf32> -> vector<16x96xf32>
    %41 = vector.broadcast %13 : vector<1x96xf32> to vector<16x96xf32>
    %42 = arith.addf %40, %41 : vector<16x96xf32>
    %43 = vector.shape_cast %42 : vector<16x96xf32> to vector<2x8x96xf32>
    %44 = arith.truncf %43 : vector<2x8x96xf32> to vector<2x8x96xbf16>
    %c0_14 = arith.constant 0 : index
    %c0_15 = arith.constant 0 : index
    %c0_16 = arith.constant 0 : index
    %45 = vector.load %arg3[%c0_14, %c0_15, %c0_16] : memref<2x8x1xf32, #tpu.memory_space<vmem>>, vector<2x8x1xf32>
    %46 = vector.extract_strided_slice %44 {offsets = [0, 0, 0], sizes = [2, 8, 8], strides = [1, 1, 1]} : vector<2x8x96xbf16> to vector<2x8x8xbf16>
    %47 = vector.extract_strided_slice %44 {offsets = [0, 0, 32], sizes = [2, 8, 8], strides = [1, 1, 1]} : vector<2x8x96xbf16> to vector<2x8x8xbf16>
    %48 = vector.extract_strided_slice %44 {offsets = [0, 0, 64], sizes = [2, 8, 8], strides = [1, 1, 1]} : vector<2x8x96xbf16> to vector<2x8x8xbf16>
    "tpu.trace_start"() <{level = 10 : i32, message = "bqd,bkd->bqk"}> : () -> ()
    %cst_17 = arith.constant dense<0.000000e+00> : vector<2x8x8xf32>
    %49 = tpu.matmul %46, %47, %cst_17 {dimension_numbers = #tpu.dot_dimension_numbers<[2], [2], [1], [1], [0, 0, 0, 1, 1, 1], [0], [0]>} : vector<2x8x8xbf16>, vector<2x8x8xbf16>, vector<2x8x8xf32> -> vector<2x8x8xf32>
    "tpu.trace_stop"() : () -> ()
    %cst_18 = arith.constant 0.353553385 : f32
    %50 = vector.broadcast %cst_18 : f32 to vector<2x8x8xf32>
    %51 = arith.mulf %49, %50 : vector<2x8x8xf32>
    %52 = vector.broadcast %45 : vector<2x8x1xf32> to vector<2x8x8xf32>
    %53 = arith.addf %51, %52 : vector<2x8x8xf32>
    %cst_19 = arith.constant dense<0xFF800000> : vector<2x8xf32>
    %54 = vector.multi_reduction <maximumf>, %53, %cst_19 [2] : vector<2x8x8xf32> to vector<2x8xf32>
    %55 = vector.shape_cast %54 : vector<2x8xf32> to vector<2x8x1xf32>
    %56 = vector.broadcast %55 : vector<2x8x1xf32> to vector<2x8x8xf32>
    %57 = arith.subf %53, %56 : vector<2x8x8xf32>
    %58 = math.exp %57 : vector<2x8x8xf32>
    %cst_20 = arith.constant dense<0.000000e+00> : vector<2x8xf32>
    %59 = vector.multi_reduction <add>, %58, %cst_20 [2] : vector<2x8x8xf32> to vector<2x8xf32>
    %60 = vector.shape_cast %59 : vector<2x8xf32> to vector<2x8x1xf32>
    %61 = tpu.reciprocal %60 {approx = true} : vector<2x8x1xf32> -> vector<2x8x1xf32>
    %62 = vector.broadcast %61 : vector<2x8x1xf32> to vector<2x8x8xf32>
    %63 = arith.mulf %58, %62 : vector<2x8x8xf32>
    %64 = arith.truncf %63 : vector<2x8x8xf32> to vector<2x8x8xbf16>
    "tpu.trace_start"() <{level = 10 : i32, message = "bqk,bkd->bqd"}> : () -> ()
    %cst_21 = arith.constant dense<0.000000e+00> : vector<2x8x8xf32>
    %65 = tpu.matmul %64, %48, %cst_21 {dimension_numbers = #tpu.dot_dimension_numbers<[2], [1], [1], [2], [0, 0, 0, 1, 1, 2], [0], [0]>} : vector<2x8x8xbf16>, vector<2x8x8xbf16>, vector<2x8x8xf32> -> vector<2x8x8xf32>
    "tpu.trace_stop"() : () -> ()
    %c0_22 = arith.constant 0 : index
    %c0_23 = arith.constant 0 : index
    %c0_24 = arith.constant 0 : index
    %66 = vector.load %arg10[%c0_22, %c0_23, %c0_24] : memref<2x8x32xf32, #tpu.memory_space<vmem>>, vector<2x8x8xf32>
    tpu.vector_store %arg10[%c0_22, %c0_23, %c0_24], %65 {strides = array<i32>} : memref<2x8x32xf32, #tpu.memory_space<vmem>>, vector<2x8x8xf32>,
    %67 = vector.extract_strided_slice %44 {offsets = [0, 0, 8], sizes = [2, 8, 8], strides = [1, 1, 1]} : vector<2x8x96xbf16> to vector<2x8x8xbf16>
    %68 = vector.extract_strided_slice %44 {offsets = [0, 0, 40], sizes = [2, 8, 8], strides = [1, 1, 1]} : vector<2x8x96xbf16> to vector<2x8x8xbf16>
    %69 = vector.extract_strided_slice %44 {offsets = [0, 0, 72], sizes = [2, 8, 8], strides = [1, 1, 1]} : vector<2x8x96xbf16> to vector<2x8x8xbf16>
    "tpu.trace_start"() <{level = 10 : i32, message = "bqd,bkd->bqk"}> : () -> ()
    %cst_25 = arith.constant dense<0.000000e+00> : vector<2x8x8xf32>
    %70 = tpu.matmul %67, %68, %cst_25 {dimension_numbers = #tpu.dot_dimension_numbers<[2], [2], [1], [1], [0, 0, 0, 1, 1, 1], [0], [0]>} : vector<2x8x8xbf16>, vector<2x8x8xbf16>, vector<2x8x8xf32> -> vector<2x8x8xf32>
    "tpu.trace_stop"() : () -> ()
    %cst_26 = arith.constant 0.353553385 : f32
    %71 = vector.broadcast %cst_26 : f32 to vector<2x8x8xf32>
    %72 = arith.mulf %70, %71 : vector<2x8x8xf32>
    %73 = vector.broadcast %45 : vector<2x8x1xf32> to vector<2x8x8xf32>
    %74 = arith.addf %72, %73 : vector<2x8x8xf32>
    %cst_27 = arith.constant dense<0xFF800000> : vector<2x8xf32>
    %75 = vector.multi_reduction <maximumf>, %74, %cst_27 [2] : vector<2x8x8xf32> to vector<2x8xf32>
    %76 = vector.shape_cast %75 : vector<2x8xf32> to vector<2x8x1xf32>
    %77 = vector.broadcast %76 : vector<2x8x1xf32> to vector<2x8x8xf32>
    %78 = arith.subf %74, %77 : vector<2x8x8xf32>
    %79 = math.exp %78 : vector<2x8x8xf32>
    %cst_28 = arith.constant dense<0.000000e+00> : vector<2x8xf32>
    %80 = vector.multi_reduction <add>, %79, %cst_28 [2] : vector<2x8x8xf32> to vector<2x8xf32>
    %81 = vector.shape_cast %80 : vector<2x8xf32> to vector<2x8x1xf32>
    %82 = tpu.reciprocal %81 {approx = true} : vector<2x8x1xf32> -> vector<2x8x1xf32>
    %83 = vector.broadcast %82 : vector<2x8x1xf32> to vector<2x8x8xf32>
    %84 = arith.mulf %79, %83 : vector<2x8x8xf32>
    %85 = arith.truncf %84 : vector<2x8x8xf32> to vector<2x8x8xbf16>
    "tpu.trace_start"() <{level = 10 : i32, message = "bqk,bkd->bqd"}> : () -> ()
    %cst_29 = arith.constant dense<0.000000e+00> : vector<2x8x8xf32>
    %86 = tpu.matmul %85, %69, %cst_29 {dimension_numbers = #tpu.dot_dimension_numbers<[2], [1], [1], [2], [0, 0, 0, 1, 1, 2], [0], [0]>} : vector<2x8x8xbf16>, vector<2x8x8xbf16>, vector<2x8x8xf32> -> vector<2x8x8xf32>
    "tpu.trace_stop"() : () -> ()
    %c0_30 = arith.constant 0 : index
    %c0_31 = arith.constant 0 : index
    %c8 = arith.constant 8 : index
    %87 = vector.load %arg10[%c0_30, %c0_31, %c8] : memref<2x8x32xf32, #tpu.memory_space<vmem>>, vector<2x8x8xf32>
    tpu.vector_store %arg10[%c0_30, %c0_31, %c8], %86 {strides = array<i32>} : memref<2x8x32xf32, #tpu.memory_space<vmem>>, vector<2x8x8xf32>,
    %88 = vector.extract_strided_slice %44 {offsets = [0, 0, 16], sizes = [2, 8, 8], strides = [1, 1, 1]} : vector<2x8x96xbf16> to vector<2x8x8xbf16>
    %89 = vector.extract_strided_slice %44 {offsets = [0, 0, 48], sizes = [2, 8, 8], strides = [1, 1, 1]} : vector<2x8x96xbf16> to vector<2x8x8xbf16>
    %90 = vector.extract_strided_slice %44 {offsets = [0, 0, 80], sizes = [2, 8, 8], strides = [1, 1, 1]} : vector<2x8x96xbf16> to vector<2x8x8xbf16>
    "tpu.trace_start"() <{level = 10 : i32, message = "bqd,bkd->bqk"}> : () -> ()
    %cst_32 = arith.constant dense<0.000000e+00> : vector<2x8x8xf32>
    %91 = tpu.matmul %88, %89, %cst_32 {dimension_numbers = #tpu.dot_dimension_numbers<[2], [2], [1], [1], [0, 0, 0, 1, 1, 1], [0], [0]>} : vector<2x8x8xbf16>, vector<2x8x8xbf16>, vector<2x8x8xf32> -> vector<2x8x8xf32>
    "tpu.trace_stop"() : () -> ()
    %cst_33 = arith.constant 0.353553385 : f32
    %92 = vector.broadcast %cst_33 : f32 to vector<2x8x8xf32>
    %93 = arith.mulf %91, %92 : vector<2x8x8xf32>
    %94 = vector.broadcast %45 : vector<2x8x1xf32> to vector<2x8x8xf32>
    %95 = arith.addf %93, %94 : vector<2x8x8xf32>
    %cst_34 = arith.constant dense<0xFF800000> : vector<2x8xf32>
    %96 = vector.multi_reduction <maximumf>, %95, %cst_34 [2] : vector<2x8x8xf32> to vector<2x8xf32>
    %97 = vector.shape_cast %96 : vector<2x8xf32> to vector<2x8x1xf32>
    %98 = vector.broadcast %97 : vector<2x8x1xf32> to vector<2x8x8xf32>
    %99 = arith.subf %95, %98 : vector<2x8x8xf32>
    %100 = math.exp %99 : vector<2x8x8xf32>
    %cst_35 = arith.constant dense<0.000000e+00> : vector<2x8xf32>
    %101 = vector.multi_reduction <add>, %100, %cst_35 [2] : vector<2x8x8xf32> to vector<2x8xf32>
    %102 = vector.shape_cast %101 : vector<2x8xf32> to vector<2x8x1xf32>
    %103 = tpu.reciprocal %102 {approx = true} : vector<2x8x1xf32> -> vector<2x8x1xf32>
    %104 = vector.broadcast %103 : vector<2x8x1xf32> to vector<2x8x8xf32>
    %105 = arith.mulf %100, %104 : vector<2x8x8xf32>
    %106 = arith.truncf %105 : vector<2x8x8xf32> to vector<2x8x8xbf16>
    "tpu.trace_start"() <{level = 10 : i32, message = "bqk,bkd->bqd"}> : () -> ()
    %cst_36 = arith.constant dense<0.000000e+00> : vector<2x8x8xf32>
    %107 = tpu.matmul %106, %90, %cst_36 {dimension_numbers = #tpu.dot_dimension_numbers<[2], [1], [1], [2], [0, 0, 0, 1, 1, 2], [0], [0]>} : vector<2x8x8xbf16>, vector<2x8x8xbf16>, vector<2x8x8xf32> -> vector<2x8x8xf32>
    "tpu.trace_stop"() : () -> ()
    %c0_37 = arith.constant 0 : index
    %c0_38 = arith.constant 0 : index
    %c16 = arith.constant 16 : index
    %108 = vector.load %arg10[%c0_37, %c0_38, %c16] : memref<2x8x32xf32, #tpu.memory_space<vmem>>, vector<2x8x8xf32>
    tpu.vector_store %arg10[%c0_37, %c0_38, %c16], %107 {strides = array<i32>} : memref<2x8x32xf32, #tpu.memory_space<vmem>>, vector<2x8x8xf32>,
    %109 = vector.extract_strided_slice %44 {offsets = [0, 0, 24], sizes = [2, 8, 8], strides = [1, 1, 1]} : vector<2x8x96xbf16> to vector<2x8x8xbf16>
    %110 = vector.extract_strided_slice %44 {offsets = [0, 0, 56], sizes = [2, 8, 8], strides = [1, 1, 1]} : vector<2x8x96xbf16> to vector<2x8x8xbf16>
    %111 = vector.extract_strided_slice %44 {offsets = [0, 0, 88], sizes = [2, 8, 8], strides = [1, 1, 1]} : vector<2x8x96xbf16> to vector<2x8x8xbf16>
    "tpu.trace_start"() <{level = 10 : i32, message = "bqd,bkd->bqk"}> : () -> ()
    %cst_39 = arith.constant dense<0.000000e+00> : vector<2x8x8xf32>
    %112 = tpu.matmul %109, %110, %cst_39 {dimension_numbers = #tpu.dot_dimension_numbers<[2], [2], [1], [1], [0, 0, 0, 1, 1, 1], [0], [0]>} : vector<2x8x8xbf16>, vector<2x8x8xbf16>, vector<2x8x8xf32> -> vector<2x8x8xf32>
    "tpu.trace_stop"() : () -> ()
    %cst_40 = arith.constant 0.353553385 : f32
    %113 = vector.broadcast %cst_40 : f32 to vector<2x8x8xf32>
    %114 = arith.mulf %112, %113 : vector<2x8x8xf32>
    %115 = vector.broadcast %45 : vector<2x8x1xf32> to vector<2x8x8xf32>
    %116 = arith.addf %114, %115 : vector<2x8x8xf32>
    %cst_41 = arith.constant dense<0xFF800000> : vector<2x8xf32>
    %117 = vector.multi_reduction <maximumf>, %116, %cst_41 [2] : vector<2x8x8xf32> to vector<2x8xf32>
    %118 = vector.shape_cast %117 : vector<2x8xf32> to vector<2x8x1xf32>
    %119 = vector.broadcast %118 : vector<2x8x1xf32> to vector<2x8x8xf32>
    %120 = arith.subf %116, %119 : vector<2x8x8xf32>
    %121 = math.exp %120 : vector<2x8x8xf32>
    %cst_42 = arith.constant dense<0.000000e+00> : vector<2x8xf32>
    %122 = vector.multi_reduction <add>, %121, %cst_42 [2] : vector<2x8x8xf32> to vector<2x8xf32>
    %123 = vector.shape_cast %122 : vector<2x8xf32> to vector<2x8x1xf32>
    %124 = tpu.reciprocal %123 {approx = true} : vector<2x8x1xf32> -> vector<2x8x1xf32>
    %125 = vector.broadcast %124 : vector<2x8x1xf32> to vector<2x8x8xf32>
    %126 = arith.mulf %121, %125 : vector<2x8x8xf32>
    %127 = arith.truncf %126 : vector<2x8x8xf32> to vector<2x8x8xbf16>
    "tpu.trace_start"() <{level = 10 : i32, message = "bqk,bkd->bqd"}> : () -> ()
    %cst_43 = arith.constant dense<0.000000e+00> : vector<2x8x8xf32>
    %128 = tpu.matmul %127, %111, %cst_43 {dimension_numbers = #tpu.dot_dimension_numbers<[2], [1], [1], [2], [0, 0, 0, 1, 1, 2], [0], [0]>} : vector<2x8x8xbf16>, vector<2x8x8xbf16>, vector<2x8x8xf32> -> vector<2x8x8xf32>
    "tpu.trace_stop"() : () -> ()
    %c0_44 = arith.constant 0 : index
    %c0_45 = arith.constant 0 : index
    %c24 = arith.constant 24 : index
    %129 = vector.load %arg10[%c0_44, %c0_45, %c24] : memref<2x8x32xf32, #tpu.memory_space<vmem>>, vector<2x8x8xf32>
    tpu.vector_store %arg10[%c0_44, %c0_45, %c24], %128 {strides = array<i32>} : memref<2x8x32xf32, #tpu.memory_space<vmem>>, vector<2x8x8xf32>,
    %c0_46 = arith.constant 0 : index
    %c0_47 = arith.constant 0 : index
    %c0_48 = arith.constant 0 : index
    %130 = vector.load %arg10[%c0_46, %c0_47, %c0_48] : memref<2x8x32xf32, #tpu.memory_space<vmem>>, vector<2x8x32xf32>
    %131 = vector.shape_cast %130 : vector<2x8x32xf32> to vector<16x32xf32>
    %132 = arith.truncf %131 : vector<16x32xf32> to vector<16x32xbf16>
    %c0_49 = arith.constant 0 : index
    %c0_50 = arith.constant 0 : index
    %c0_51 = arith.constant 0 : index
    %133 = vector.load %arg5[%c0_49, %c0_50, %c0_51] : memref<1x32x32xbf16, #tpu.memory_space<vmem>>, vector<1x32x32xbf16>
    %134 = vector.shape_cast %133 : vector<1x32x32xbf16> to vector<32x32xbf16>
    %cst_52 = arith.constant dense<0.000000e+00> : vector<16x32xf32>
    %135 = tpu.matmul %132, %134, %cst_52 {dimension_numbers = #tpu.dot_dimension_numbers<[1], [0], [0], [1], [0, 0, 1, 1], [], []>} : vector<16x32xbf16>, vector<32x32xbf16>, vector<16x32xf32> -> vector<16x32xf32>
    %136 = vector.broadcast %9 : vector<1x32xf32> to vector<16x32xf32>
    %137 = arith.addf %135, %136 : vector<16x32xf32>
    %138 = arith.addf %4, %137 : vector<16x32xf32>
    %cst_53 = arith.constant dense<0.000000e+00> : vector<16xf32>
    %139 = vector.multi_reduction <add>, %138, %cst_53 [1] : vector<16x32xf32> to vector<16xf32>
    %140 = vector.shape_cast %139 : vector<16xf32> to vector<16x1xf32>
    %cst_54 = arith.constant 3.200000e+01 : f32
    %141 = vector.broadcast %cst_54 : f32 to vector<16x1xf32>
    %142 = arith.divf %140, %141 : vector<16x1xf32>
    %143 = vector.broadcast %142 : vector<16x1xf32> to vector<16x32xf32>
    %144 = arith.subf %138, %143 : vector<16x32xf32>
    %145 = arith.mulf %144, %144 : vector<16x32xf32>
    %cst_55 = arith.constant dense<0.000000e+00> : vector<16xf32>
    %146 = vector.multi_reduction <add>, %145, %cst_55 [1] : vector<16x32xf32> to vector<16xf32>
    %147 = vector.shape_cast %146 : vector<16xf32> to vector<16x1xf32>
    %cst_56 = arith.constant 3.200000e+01 : f32
    %148 = vector.broadcast %cst_56 : f32 to vector<16x1xf32>
    %149 = arith.divf %147, %148 : vector<16x1xf32>
    %150 = vector.broadcast %142 : vector<16x1xf32> to vector<16x32xf32>
    %151 = arith.subf %138, %150 : vector<16x32xf32>
    %cst_57 = arith.constant 9.99999996E-13 : f32
    %152 = vector.broadcast %cst_57 : f32 to vector<16x1xf32>
    %153 = arith.addf %149, %152 : vector<16x1xf32>
    %154 = math.rsqrt %153 : vector<16x1xf32>
    %155 = vector.broadcast %154 : vector<16x1xf32> to vector<16x32xf32>
    %156 = arith.mulf %151, %155 : vector<16x32xf32>
    %157 = vector.broadcast %10 : vector<1x32xf32> to vector<16x32xf32>
    %158 = arith.mulf %157, %156 : vector<16x32xf32>
    %159 = vector.broadcast %11 : vector<1x32xf32> to vector<16x32xf32>
    %160 = arith.addf %158, %159 : vector<16x32xf32>
    %161 = arith.truncf %160 : vector<16x32xf32> to vector<16x32xbf16>
    %c0_58 = arith.constant 0 : index
    %c0_59 = arith.constant 0 : index
    %c0_60 = arith.constant 0 : index
    %162 = vector.load %arg6[%c0_58, %c0_59, %c0_60] : memref<1x32x128xbf16, #tpu.memory_space<vmem>>, vector<1x32x128xbf16>
    %163 = vector.shape_cast %162 : vector<1x32x128xbf16> to vector<32x128xbf16>
    %cst_61 = arith.constant dense<0.000000e+00> : vector<16x128xf32>
    %164 = tpu.matmul %161, %163, %cst_61 {dimension_numbers = #tpu.dot_dimension_numbers<[1], [0], [0], [1], [0, 0, 1, 1], [], []>} : vector<16x32xbf16>, vector<32x128xbf16>, vector<16x128xf32> -> vector<16x128xf32>
    %165 = vector.broadcast %14 : vector<1x128xf32> to vector<16x128xf32>
    %166 = arith.addf %164, %165 : vector<16x128xf32>
    %cst_62 = arith.constant 5.000000e-01 : f32
    %167 = vector.broadcast %cst_62 : f32 to vector<16x128xf32>
    %168 = arith.mulf %167, %166 : vector<16x128xf32>
    %169 = arith.mulf %166, %166 : vector<16x128xf32>
    %170 = arith.mulf %169, %166 : vector<16x128xf32>
    %cst_63 = arith.constant 4.471500e-02 : f32
    %171 = vector.broadcast %cst_63 : f32 to vector<16x128xf32>
    %172 = arith.mulf %171, %170 : vector<16x128xf32>
    %173 = arith.addf %166, %172 : vector<16x128xf32>
    %cst_64 = arith.constant 0.797884583 : f32
    %174 = vector.broadcast %cst_64 : f32 to vector<16x128xf32>
    %175 = arith.mulf %174, %173 : vector<16x128xf32>
    %176 = math.tanh %175 : vector<16x128xf32>
    %cst_65 = arith.constant 1.000000e+00 : f32
    %177 = vector.broadcast %cst_65 : f32 to vector<16x128xf32>
    %178 = arith.addf %177, %176 : vector<16x128xf32>
    %179 = arith.mulf %168, %178 : vector<16x128xf32>
    %180 = arith.truncf %179 : vector<16x128xf32> to vector<16x128xbf16>
    %c0_66 = arith.constant 0 : index
    %c0_67 = arith.constant 0 : index
    %c0_68 = arith.constant 0 : index
    %181 = vector.load %arg7[%c0_66, %c0_67, %c0_68] : memref<1x128x32xbf16, #tpu.memory_space<vmem>>, vector<1x128x32xbf16>
    %182 = vector.shape_cast %181 : vector<1x128x32xbf16> to vector<128x32xbf16>
    %cst_69 = arith.constant dense<0.000000e+00> : vector<16x32xf32>
    %183 = tpu.matmul %180, %182, %cst_69 {dimension_numbers = #tpu.dot_dimension_numbers<[1], [0], [0], [1], [0, 0, 1, 1], [], []>} : vector<16x128xbf16>, vector<128x32xbf16>, vector<16x32xf32> -> vector<16x32xf32>
    %184 = vector.broadcast %12 : vector<1x32xf32> to vector<16x32xf32>
    %185 = arith.addf %183, %184 : vector<16x32xf32>
    %186 = arith.addf %138, %185 : vector<16x32xf32>
    %187 = vector.shape_cast %186 : vector<16x32xf32> to vector<2x8x32xf32>
    %c0_70 = arith.constant 0 : index
    %c0_71 = arith.constant 0 : index
    %c0_72 = arith.constant 0 : index
    %188 = vector.load %arg9[%c0_70, %c0_71, %c0_72] : memref<2x8x32xf32, #tpu.memory_space<vmem>>, vector<2x8x32xf32>
    tpu.vector_store %arg9[%c0_70, %c0_71, %c0_72], %187 {strides = array<i32>} : memref<2x8x32xf32, #tpu.memory_space<vmem>>, vector<2x8x32xf32>,
    return
  }
  func.func @transform_0(%arg0: i32, %arg1: i32) -> (i32, i32, i32) {
    %c0_i32 = arith.constant 0 : i32
    %c0_i32_0 = arith.constant 0 : i32
    %c0_i32_1 = arith.constant 0 : i32
    return %arg0, %c0_i32, %c0_i32_0 : i32, i32, i32
  }
  func.func @transform_1(%arg0: i32, %arg1: i32) -> (i32, i32, i32) {
    %c0_i32 = arith.constant 0 : i32
    %c0_i32_0 = arith.constant 0 : i32
    %c0_i32_1 = arith.constant 0 : i32
    return %arg0, %c0_i32, %c0_i32_0 : i32, i32, i32
  }
  func.func @transform_2(%arg0: i32, %arg1: i32) -> (i32, i32, i32) {
    %c0_i32 = arith.constant 0 : i32
    %c0_i32_0 = arith.constant 0 : i32
    %c0_i32_1 = arith.constant 0 : i32
    return %arg1, %c0_i32, %c0_i32_0 : i32, i32, i32
  }
  func.func @transform_3(%arg0: i32, %arg1: i32) -> (i32, i32, i32) {
    %c0_i32 = arith.constant 0 : i32
    %c0_i32_0 = arith.constant 0 : i32
    %c0_i32_1 = arith.constant 0 : i32
    return %arg1, %c0_i32, %c0_i32_0 : i32, i32, i32
  }
  func.func @transform_4(%arg0: i32, %arg1: i32) -> (i32, i32, i32) {
    %c0_i32 = arith.constant 0 : i32
    %c0_i32_0 = arith.constant 0 : i32
    %c0_i32_1 = arith.constant 0 : i32
    return %arg1, %c0_i32, %c0_i32_0 : i32, i32, i32
  }
  func.func @transform_5(%arg0: i32, %arg1: i32) -> (i32, i32, i32) {
    %c0_i32 = arith.constant 0 : i32
    %c0_i32_0 = arith.constant 0 : i32
    %c0_i32_1 = arith.constant 0 : i32
    return %arg1, %c0_i32, %c0_i32_0 : i32, i32, i32
  }
  func.func @transform_6(%arg0: i32, %arg1: i32) -> (i32, i32, i32) {
    %c0_i32 = arith.constant 0 : i32
    %c0_i32_0 = arith.constant 0 : i32
    %c0_i32_1 = arith.constant 0 : i32
    return %arg1, %c0_i32, %c0_i32_0 : i32, i32, i32
  }
  func.func @transform_7(%arg0: i32, %arg1: i32) -> (i32, i32, i32) {
    %c0_i32 = arith.constant 0 : i32
    %c0_i32_0 = arith.constant 0 : i32
    %c0_i32_1 = arith.constant 0 : i32
    return %arg0, %c0_i32, %c0_i32_0 : i32, i32, i32
  }
}

</mosaic_0001>

<bundles_post_ra>
// kernel: tpu_custom_call.1
= control target key start
LH: loop header
LB: loop body
LE: loop exit
PB: predicated region body
PF: predicated region fallthrough
CT: control target
= control target key end

     0   :  { %s3454_s0 = inlined_call_operand.hbm [shape: f32[2,8,32], index: 0, kind: input, shape index: {}]   ;;  %s3455_s1 = inlined_call_operand.hbm [shape: f32[2,8,1], index: 1, kind: input, shape index: {}]   ;;  %s3456_s2 = inlined_call_operand.hbm [shape: bf16[2,32,96], index: 2, kind: input, shape index: {}]   ;;  %s3457_s3 = inlined_call_operand.hbm [shape: bf16[2,32,32], index: 3, kind: input, shape index: {}]   ;;  %s3458_s4 = inlined_call_operand.hbm [shape: bf16[2,32,128], index: 4, kind: input, shape index: {}]   ;;  %s3459_s5 = inlined_call_operand.hbm [shape: bf16[2,128,32], index: 5, kind: input, shape index: {}]   ;;  %s3460_s6 = inlined_call_operand.hbm [shape: f32[2,8,128], index: 6, kind: input, shape index: {}]   ;;  %s3461_s7 = inlined_call_operand.hbm [shape: f32[2,8,32], index: 7, kind: output, shape index: {}]  }
   0x1   :  { %3476 = sst [smem:[#allocation21_spill]] %s3454_s0 }
   0x2   :  { %3477 = sst [smem:[#allocation22_spill]] %s3456_s2 }
   0x3   :  { %3478 = sst [smem:[#allocation23_spill]] %s3457_s3 }
   0x4   :  { %12 = vsyncpa [#allocation4], 0 }
   0x5   :  { %13 = vsyncpa [#allocation7], 0 }
   0x6   :  { %14 = vsyncpa [#allocation5], 0  ;;  %s2846_s24 = smov 0   ;;  %s2848_s25 = smov 0  }
   0x7   :  { %s2850_s26 = smov 0   ;;  %s2852_s27 = smov 0  }
   0x8   :  { %s2854_s28 = smov 0   ;;  %s2856_s29 = smov 0  }
   0x9 LB: > { %3479 = sst [smem:[#allocation18_spill]] %s2762_s26  ;;  %s2875_s30 = sadd.s32 4294967295, %s2774_s29   ;;  %s2774_s29 = sphi %s2856_s29, %s20_s29   ;;  %s2770_s28 = sphi %s2854_s28, %s3510_s28   ;;  %s2766_s27 = sphi %s2852_s27, %s3509_s27   ;;  %s2762_s26 = sphi %s2850_s26, %s3505_s26   ;;  %s2758_s25 = sphi %s2848_s25, %s3508_s25   ;;  %s2754_s24 = sphi %s2846_s24, %s3507_s24  }
   0xa   : > { %s91_s8 = sadd.s32 1, %s2762_s26  ;;  %p98_p0 = scmp.ne.s32.totalorder %s2762_s26, %s2758_s25 }
   0xb   : > { %p99_p1 = scmp.eq.s32.totalorder %s2774_s29, 0  ;;  %p104_p2 = scmp.ne.s32.totalorder %s2758_s25, %s2754_s24 }
   0xc   : > { %p3462_p3 = scmp.eq.s32.totalorder %s2875_s30, 0  ;;  %p2037_p5 = scmp.ge.s32.totalorder %s2774_s29, 1 }
   0xd   : > { %p100_p4 = por %p99_p1, %p98_p0  ;;  %p245_p7 = scmp.lt.s32.totalorder %s2774_s29, 3 }
   0xe   : > { %p2886_p6 = por %p3462_p3, %p104_p2  ;;  %s2776_s11 = smov [#allocation3]  }
   0xf   : > { %p2891_p8 = pnand %p2037_p5, %p245_p7  ;;  %s260_s12 = sshll.u32 %s2776_s11, 4  ;;  %s261_s12 = int_to_ptr.vmem [resolvable:$true] %s260_s12 }
  0x10   : > { %s3480_s9 = scalar_select %p2886_p6, 1, 0 }
  0x11   : > { %s3481_s10 = scalar_select %p2891_p8, 1, 0 }
  0x12   : > { %p2317_p9 = pneg %p2891_p8  ;;  %p2342_p10 = scmp.lt.s32.totalorder %s2774_s29, 2 }
  0x13   : > { %s29_s15 = sadd.s32 1, %s2770_s28  ;;  %s3484_s0 = sld [smem:[#allocation21_spill]] }
  0x14   : > { %p2900_p11 = pnand %p2317_p9, %p3462_p3  ;;  %p2904_p12 = pnand %p2342_p10, %p100_p4 }
  0x16   : > { %s3482_s13 = scalar_select %p2900_p11, 1, 0 }
  0x17   : > { %s3483_s14 = scalar_select %p2904_p12, 1, 0 }
  0x18   : > { %p3469_p0 = pneg %p2900_p11 }
  0x19   : > { %s2480_s18 = scalar_lea.hbm %s3484_s0, 256 }
  0x1a   : > { %p2481_p13 = scmp.ne.s32.totalorder %s3484_s0, %s2480_s18  ;;  %p2487_p4 = scmp.lt.u32.totalorder %s2480_s18, %s3484_s0 }
  0x1c   : > { %p2483_p1 = pnand %p3469_p0, %p2481_p13 }
  0x1e   : > { %p2484_p2 = pneg %p2483_p1 }
  0x20   : > { %p2489_p5 = pnand %p2487_p4, %p2484_p2 }
  0x22   : > { %2492 = shalt.err (!%p2489_p5)
}
  0x23   : > { %s2493_s23 = scalar_lea.vmem %s261_s12, 256  ;;  %p2501_p3 = scmp.lt.s32.totalorder %s261_s12, %s261_s12 }
  0x24   : > { %p2494_p7 = scmp.ne.s32.totalorder %s261_s12, %s2493_s23  ;;  %p2502_p6 = scmp.lt.s32.totalorder %s2493_s23, %s2493_s23 }
  0x26   : > { %p2496_p9 = pnand %p2494_p7, %p3469_p0  ;;  %p2503_p8 = por %p2502_p6, %p2501_p3 }
  0x28   : > { %p2497_p10 = pneg %p2496_p9 }
  0x2a   : > { %p2504_p12 = pnand %p2503_p8, %p2497_p10 }
  0x2c   : > { %2507 = shalt.err (!%p2504_p12)
}
  0x2d   : > { %s3466_s24 = smov 128   ;;  %s3467_s11 = smov 8  }
  0x2e   : > { %2320 = dma.hbm_to_vmem [thread:$0]  (!%p2900_p11), %s3484_s0, 256, %s261_s12, [#allocation4], %s3466_s24, %s3466_s24, %s3467_s11  }
  0x2f   : > { %p30_p3 = scmp.ge.s32.totalorder %s29_s15, 2  ;;  %s290_s18 = sand.u32 1, %s2774_s29  }
  0x30   : > { %s2936_s19 = sand.u32 1, %s2762_s26   ;;  %s2946_s22 = sshll.u32 %s2770_s28, 8 }
  0x31   : > { %s3512_s15 = smov (%p30_p3, %s29_s15), 0  ;;  %s2941_s20 = sshll.u32 %s2936_s19, 4 }
  0x32   : > { %3485 = sst [smem:[#allocation19_spill]] %s3512_s15  ;;  %s88_s21 = ssub.s32 %s2770_s28, %s3512_s15 }
  0x33   : > { %p89_p6 = scmp.eq.s32.totalorder %s88_s21, 0  ;;  %s3486_s2 = sld [smem:[#allocation22_spill]] }
  0x34   : > { %s294_s17 = scalar_lea.vmem [#allocation8], %s2941_s20  ;;  %s2962_s21 = scalar_lea.sflag [#allocation4], %s290_s18 }
  0x35   : > { %s301_s24 = sshll.u32 %s294_s17, 4  ;;  %p3488_p12 = scmp.ne.s32.totalorder %s3483_s14, 0  ;;  %s2960_s24 = int_to_ptr.vmem [resolvable:$true] %s301_s24 }
  0x36   : > { %s2958_s11 = scalar_select %p89_p6, %s2762_s26, %s91_s8  }
  0x37   : > { %p2968_p13 = pneg %p3488_p12 }
  0x38   : > { %3487 = sst [smem:[#allocation20_spill]] %s2958_s11 }
  0x39   : > { %s2952_s12 = scalar_lea.hbm %s3486_s2, %s2946_s22  ;;  %s2513_s8 = scalar_lea.hbm %s3486_s2, 512 }
  0x3a   : > { %s2508_s0 = scalar_lea.hbm %s2952_s12, 256  ;;  %p2514_p4 = scmp.lt.u32.totalorder %s2952_s12, %s3486_s2 }
  0x3b   : > { %p2509_p8 = scmp.ne.s32.totalorder %s2952_s12, %s2508_s0  ;;  %p2515_p5 = scmp.lt.u32.totalorder %s2513_s8, %s2508_s0 }
  0x3c   : > { %s3489_s23 = scalar_select %p2968_p13, 1, 0 }
  0x3d   : > { %p2511_p1 = pnand %p2968_p13, %p2509_p8  ;;  %p2516_p7 = por %p2515_p5, %p2514_p4 }
  0x3e   : > { %p2517_p9 = scmp.lt.u32.totalorder %s2508_s0, %s2952_s12 }
  0x3f   : > { %p2512_p2 = pneg %p2511_p1 }
  0x40   : > { %p2518_p10 = por %p2517_p9, %p2516_p7 }
  0x42   : > { %p2519_p3 = pnand %p2518_p10, %p2512_p2 }
  0x44   : > { %2522 = shalt.err (!%p2519_p3)
}
  0x45   : > { %s2523_s18 = scalar_lea.vmem %s2960_s24, 256  ;;  %s2779_s16 = smov [#allocation8]  }
  0x46   : > { %p2524_p6 = scmp.ne.s32.totalorder %s2960_s24, %s2523_s18  ;;  %s2528_s17 = sshll.u32 %s2779_s16, 4  ;;  %s2529_s17 = int_to_ptr.vmem [resolvable:$false] %s2528_s17 }
  0x47   : > { %s2530_s15 = scalar_lea.vmem %s2529_s17, 512  ;;  %p2531_p0 = scmp.lt.s32.totalorder %s2960_s24, %s2529_s17 }
  0x48   : > { %p2526_p8 = pnand %p2524_p6, %p2968_p13  ;;  %p2532_p11 = scmp.lt.s32.totalorder %s2530_s15, %s2523_s18 }
  0x4a   : > { %p2527_p1 = pneg %p2526_p8  ;;  %p2533_p4 = por %p2532_p11, %p2531_p0 }
  0x4c   : > { %p2534_p5 = pnand %p2533_p4, %p2527_p1 }
  0x4e   : > { %2537 = shalt.err (!%p2534_p5)
}
  0x4f   : > { %s2780_s0 = smov 64   ;;  %s2781_s11 = smov 4  }
  0x50   : > { %2327 = dma.hbm_to_vmem [thread:$0]  (!%p3488_p12), %s2952_s12, 256, %s2960_s24, %s2962_s21, %s2780_s0, %s2780_s0, %s2781_s11  }
  0x51   : > { %s3490_s3 = sld [smem:[#allocation23_spill]]  ;;  %s315_s17 = scalar_lea.vmem [#allocation9], %s2941_s20 }
  0x52   : > { %s322_s15 = sshll.u32 %s315_s17, 4  ;;  %s3002_s15 = int_to_ptr.vmem [resolvable:$true] %s322_s15 }
  0x57   : > { %s2999_s18 = scalar_lea.hbm %s3490_s3, %s2946_s22  ;;  %s2543_s12 = scalar_lea.hbm %s3490_s3, 512 }
  0x58   : > { %s2538_s2 = scalar_lea.hbm %s2999_s18, 256  ;;  %p2544_p7 = scmp.lt.u32.totalorder %s2999_s18, %s3490_s3 }
  0x59   : > { %p2539_p11 = scmp.ne.s32.totalorder %s2999_s18, %s2538_s2  ;;  %p2545_p9 = scmp.lt.u32.totalorder %s2543_s12, %s2538_s2 }
  0x5a   : > { %p2547_p3 = scmp.lt.u32.totalorder %s2538_s2, %s2999_s18 }
  0x5b   : > { %p2541_p0 = pnand %p2539_p11, %p2968_p13  ;;  %p2546_p10 = por %p2545_p9, %p2544_p7 }
  0x5d   : > { %p2542_p2 = pneg %p2541_p0  ;;  %p2548_p6 = por %p2547_p3, %p2546_p10 }
  0x5f   : > { %p2549_p8 = pnand %p2548_p6, %p2542_p2 }
  0x61   : > { %2552 = shalt.err (!%p2549_p8)
}
  0x62   : > { %s2553_s17 = scalar_lea.vmem %s3002_s15, 256  ;;  %s2782_s26 = smov [#allocation9]  }
  0x63   : > { %p2554_p1 = scmp.ne.s32.totalorder %s3002_s15, %s2553_s17  ;;  %s2558_s24 = sshll.u32 %s2782_s26, 4  ;;  %s2559_s24 = int_to_ptr.vmem [resolvable:$false] %s2558_s24 }
  0x64   : > { %s2560_s8 = scalar_lea.vmem %s2559_s24, 512  ;;  %p2561_p11 = scmp.lt.s32.totalorder %s3002_s15, %s2559_s24 }
  0x65   : > { %p2556_p4 = pnand %p2554_p1, %p2968_p13  ;;  %p2562_p0 = scmp.lt.s32.totalorder %s2560_s8, %s2553_s17 }
  0x67   : > { %p2557_p5 = pneg %p2556_p4  ;;  %p2563_p7 = por %p2562_p0, %p2561_p11 }
  0x69   : > { %p2564_p9 = pnand %p2563_p7, %p2557_p5 }
  0x6b   : > { %2567 = shalt.err (!%p2564_p9)
}
  0x6c   : > { %2330 = dma.hbm_to_vmem [thread:$0]  (!%p3488_p12), %s2999_s18, 256, %s3002_s15, %s2962_s21, %s2780_s0, %s2780_s0, %s2781_s11  }
  0x6d   : > { %s3033_s16 = scalar_lea.hbm %s3458_s4, %s2946_s22  ;;  %s336_s17 = scalar_lea.vmem [#allocation10], %s2941_s20 }
  0x6e   : > { %s343_s26 = sshll.u32 %s336_s17, 4  ;;  %s2050_s24 = sshll.u32 %s2936_s19, 6  ;;  %s3036_s26 = int_to_ptr.vmem [resolvable:$true] %s343_s26 }
  0x6f   : > { %s2568_s8 = scalar_lea.hbm %s3033_s16, 256  ;;  %s2573_s2 = scalar_lea.hbm %s3458_s4, 512 }
  0x70   : > { %p2569_p2 = scmp.ne.s32.totalorder %s3033_s16, %s2568_s8  ;;  %p2574_p6 = scmp.lt.u32.totalorder %s3033_s16, %s3458_s4 }
  0x71   : > { %p2575_p8 = scmp.lt.u32.totalorder %s2573_s2, %s2568_s8  ;;  %p2577_p4 = scmp.lt.u32.totalorder %s2568_s8, %s3033_s16 }
  0x72   : > { %p2571_p10 = pnand %p2569_p2, %p2968_p13 }
  0x73   : > { %p2576_p1 = por %p2575_p8, %p2574_p6 }
  0x74   : > { %p2572_p3 = pneg %p2571_p10 }
  0x75   : > { %p2578_p5 = por %p2577_p4, %p2576_p1 }
  0x77   : > { %p2579_p11 = pnand %p2578_p5, %p2572_p3 }
  0x79   : > { %2582 = shalt.err (!%p2579_p11)
}
  0x7a   : > { %s2583_s20 = scalar_lea.vmem %s3036_s26, 256  ;;  %s2783_s17 = smov [#allocation10]  }
  0x7b   : > { %p2584_p0 = scmp.ne.s32.totalorder %s3036_s26, %s2583_s20  ;;  %s2588_s18 = sshll.u32 %s2783_s17, 4  ;;  %s2589_s18 = int_to_ptr.vmem [resolvable:$false] %s2588_s18 }
  0x7c   : > { %s2590_s15 = scalar_lea.vmem %s2589_s18, 512  ;;  %p2591_p2 = scmp.lt.s32.totalorder %s3036_s26, %s2589_s18 }
  0x7d   : > { %p2586_p7 = pnand %p2584_p0, %p2968_p13  ;;  %p2592_p10 = scmp.lt.s32.totalorder %s2590_s15, %s2583_s20 }
  0x7f   : > { %p2587_p9 = pneg %p2586_p7  ;;  %p2593_p6 = por %p2592_p10, %p2591_p2 }
  0x81   : > { %p2594_p8 = pnand %p2593_p6, %p2587_p9 }
  0x83   : > { %2597 = shalt.err (!%p2594_p8)
}
  0x84   : > { %2333 = dma.hbm_to_vmem [thread:$0]  (!%p3488_p12), %s3033_s16, 256, %s3036_s26, %s2962_s21, %s2780_s0, %s2780_s0, %s2781_s11  }
  0x85   : > { %s2104_s8 = sshll.u32 %s2770_s28, 10  ;;  %s357_s20 = scalar_lea.vmem [#allocation11], %s2050_s24 }
  0x86   : > { %s3068_s12 = scalar_lea.hbm %s3459_s5, %s2104_s8  ;;  %s364_s17 = sshll.u32 %s357_s20, 4  ;;  %s3072_s17 = int_to_ptr.vmem [resolvable:$true] %s364_s17 }
  0x87   : > { %s2598_s18 = scalar_lea.hbm %s3068_s12, 1024  ;;  %s2603_s15 = scalar_lea.hbm %s3459_s5, 2048 }
  0x88   : > { %p2599_p3 = scmp.ne.s32.totalorder %s3068_s12, %s2598_s18  ;;  %p2604_p5 = scmp.lt.u32.totalorder %s3068_s12, %s3459_s5 }
  0x89   : > { %p2605_p11 = scmp.lt.u32.totalorder %s2603_s15, %s2598_s18  ;;  %p2607_p7 = scmp.lt.u32.totalorder %s2598_s18, %s3068_s12 }
  0x8a   : > { %p2601_p1 = pnand %p2599_p3, %p2968_p13 }
  0x8b   : > { %p2606_p0 = por %p2605_p11, %p2604_p5 }
  0x8c   : > { %p2602_p4 = pneg %p2601_p1 }
  0x8d   : > { %p2608_p9 = por %p2607_p7, %p2606_p0 }
  0x8f   : > { %p2609_p2 = pnand %p2608_p9, %p2602_p4 }
  0x91   : > { %2612 = shalt.err (!%p2609_p2)
}
  0x92   : > { %s2613_s24 = scalar_lea.vmem %s3072_s17, 1024  ;;  %s2784_s22 = smov [#allocation11]  }
  0x93   : > { %p2614_p10 = scmp.ne.s32.totalorder %s3072_s17, %s2613_s24  ;;  %s2618_s20 = sshll.u32 %s2784_s22, 4  ;;  %s2619_s20 = int_to_ptr.vmem [resolvable:$false] %s2618_s20 }
  0x94   : > { %s2620_s16 = scalar_lea.vmem %s2619_s20, 2048  ;;  %p2621_p3 = scmp.lt.s32.totalorder %s3072_s17, %s2619_s20 }
  0x95   : > { %p2616_p6 = pnand %p2614_p10, %p2968_p13  ;;  %p2622_p1 = scmp.lt.s32.totalorder %s2620_s16, %s2613_s24 }
  0x97   : > { %p2617_p8 = pneg %p2616_p6  ;;  %p2623_p5 = por %p2622_p1, %p2621_p3 }
  0x99   : > { %p2624_p11 = pnand %p2623_p5, %p2617_p8 }
  0x9b   : > { %2627 = shalt.err (!%p2624_p11)
}
  0x9c   : > { %2336 = dma.hbm_to_vmem [thread:$0]  (!%p3488_p12), %s3068_s12, 1024, %s3072_s17, %s2962_s21, %s2780_s0, %s2780_s0, %s2781_s11  }
  0x9d   : > { %s2785_s18 = smov [#allocation6]   ;;  %s2053_s15 = sshll.u32 %s2936_s19, 3 }
  0x9e   : > { %s276_s26 = sshll.u32 %s2785_s18, 4  ;;  %s2628_s24 = scalar_lea.hbm %s3455_s1, 256  ;;  %s277_s26 = int_to_ptr.vmem [resolvable:$true] %s276_s26 }
  0x9f   : > { %p2629_p4 = scmp.ne.s32.totalorder %s3455_s1, %s2628_s24  ;;  %p3491_p0 = scmp.ne.s32.totalorder %s3482_s13, 0 }
  0xa0   : > { %p2635_p10 = scmp.lt.u32.totalorder %s2628_s24, %s3455_s1 }
  0xa1   : > { %p3492_p7 = pneg %p3491_p0 }
  0xa3   : > { %p2631_p9 = pnand %p2629_p4, %p3492_p7 }
  0xa5   : > { %p2632_p2 = pneg %p2631_p9 }
  0xa7   : > { %p2637_p6 = pnand %p2635_p10, %p2632_p2 }
  0xa9   : > { %2640 = shalt.err (!%p2637_p6)
}
  0xaa   : > { %s2641_s19 = scalar_lea.vmem %s277_s26, 256  ;;  %p3493_p3 = pmov %p3492_p7 }
  0xab   : > { %p2642_p8 = scmp.ne.s32.totalorder %s277_s26, %s2641_s19  ;;  %p2649_p11 = scmp.lt.s32.totalorder %s277_s26, %s277_s26 }
  0xac   : > { %p2650_p12 = scmp.lt.s32.totalorder %s2641_s19, %s2641_s19 }
  0xad   : > { %p2644_p1 = pnand %p2642_p8, %p3493_p3 }
  0xae   : > { %p2651_p13 = por %p2650_p12, %p2649_p11 }
  0xaf   : > { %p2645_p5 = pneg %p2644_p1 }
  0xb1   : > { %p2652_p4 = pnand %p2651_p13, %p2645_p5 }
  0xb3   : > { %2655 = shalt.err (!%p2652_p4)
}
  0xb4   : > { %s3494_s0 = smov 8   ;;  %s3495_s11 = smov 128  }
  0xb5   : > { %2323 = dma.hbm_to_vmem [thread:$0]  (!%p3491_p0), %s3455_s1, 256, %s277_s26, [#allocation7], %s3495_s11, %s3495_s11, %s3494_s0  }
  0xb6   : > { %s2054_s17 = sshll.u32 %s2770_s28, 7  ;;  %s378_s18 = scalar_lea.vmem [#allocation12], %s2053_s15 }
  0xb7   : > { %s385_s8 = sshll.u32 %s378_s18, 4  ;;  %s383_s22 = scalar_lea.hbm %s3460_s6, %s2054_s17  ;;  %s386_s8 = int_to_ptr.vmem [resolvable:$true] %s385_s8 }
  0xb8   : > { %s2656_s20 = scalar_lea.hbm %s383_s22, 128  ;;  %p3496_p13 = scmp.ne.s32.totalorder %s3489_s23, 0 }
  0xb9   : > { %p2657_p12 = scmp.ne.s32.totalorder %s383_s22, %s2656_s20  ;;  %s2661_s19 = scalar_lea.hbm %s3460_s6, 256 }
  0xba   : > { %p2662_p0 = scmp.lt.u32.totalorder %s383_s22, %s3460_s6  ;;  %p2663_p2 = scmp.lt.u32.totalorder %s2661_s19, %s2656_s20 }
  0xbb   : > { %p2659_p7 = pnand %p2657_p12, %p3496_p13  ;;  %p2665_p6 = scmp.lt.u32.totalorder %s2656_s20, %s383_s22 }
  0xbc   : > { %p2664_p10 = por %p2663_p2, %p2662_p0 }
  0xbd   : > { %p2660_p9 = pneg %p2659_p7 }
  0xbe   : > { %p2666_p8 = por %p2665_p6, %p2664_p10 }
  0xc0   : > { %p2667_p3 = pnand %p2666_p8, %p2660_p9 }
  0xc2   : > { %2670 = shalt.err (!%p2667_p3)
}
  0xc3   : > { %s2671_s26 = scalar_lea.vmem %s386_s8, 128  ;;  %s2786_s15 = smov [#allocation12]  }
  0xc4   : > { %p2672_p1 = scmp.ne.s32.totalorder %s386_s8, %s2671_s26  ;;  %s2676_s0 = sshll.u32 %s2786_s15, 4  ;;  %s2677_s0 = int_to_ptr.vmem [resolvable:$false] %s2676_s0 }
  0xc5   : > { %s2678_s11 = scalar_lea.vmem %s2677_s0, 256  ;;  %p2679_p4 = scmp.lt.s32.totalorder %s386_s8, %s2677_s0 }
  0xc6   : > { %p2674_p5 = pnand %p2672_p1, %p3496_p13  ;;  %p2680_p12 = scmp.lt.s32.totalorder %s2678_s11, %s2671_s26 }
  0xc8   : > { %p2675_p11 = pneg %p2674_p5  ;;  %p2681_p7 = por %p2680_p12, %p2679_p4 }
  0xca   : > { %p2682_p0 = pnand %p2681_p7, %p2675_p11 }
  0xcc   : > { %2685 = shalt.err (!%p2682_p0)
}
  0xcd   : > { %p3497_p2 = scmp.ne.s32.totalorder %s3483_s14, 0  ;;  %p3498_p9 = scmp.ne.s32.totalorder %s3481_s10, 0 }
  0xce   : > { %p3499_p10 = scmp.eq.s32.totalorder (!%p3498_p9), %s2875_s30, 0 }
  0xcf   : > { %2339 = dma.hbm_to_vmem [thread:$0]  (!%p3497_p2), %s383_s22, 128, %s386_s8, %s2962_s21  }
  0xd0   : > { %394 = sbr.rel (%p3498_p9) target bundleno = 4410 (0x113a), region = 48 }
  0xd7   : > { %2737 = dma.done.wait (%p3499_p10), [#allocation4], 256   ;;  %p3500_p13 = pmov %p3499_p10 }
  0xd8   : > { %p3501_p6 = pmov %p3499_p10 }
  0xd9   : > { %2739 = vsyncadd (%p3500_p13), [#allocation4], 4294967040 }
  0xda   : > { %2741 = dma.done.wait (%p3501_p6), [#allocation7], 256   ;;  %p3502_p8 = pmov %p3501_p6 }
  0xdb   : > { %s404_s14 = sand.u32 1, %s2875_s30   ;;  %s406_s21 = sand.u32 1, %s2758_s25  }
  0xdc   : > { %2743 = vsyncadd (%p3502_p8), [#allocation7], 4294967040  ;;  %s3152_s23 = sshll.u32 %s406_s21, 4  ;;  %s405_s10 = scalar_lea.sflag [#allocation4], %s404_s14 }
  0xdd   : > { %s408_s17 = scalar_lea.vmem [#allocation8], %s3152_s23  ;;  %p3503_p3 = scmp.ne.s32.totalorder %s3480_s9, 0 }
  0xdf   : > { %2745 = dma.done.wait (%p3503_p3), %s405_s10, 1920  }
  0xe0   : > { %2747 = vsyncadd (%p3503_p3), %s405_s10, 4294965376  ;;  %s2061_s18 = sshll.u32 %s406_s21, 6  ;;  %s2062_s8 = sshll.u32 %s406_s21, 3 }
  0xe1   : > { %s417_s2 = scalar_lea.vmem [#allocation9], %s3152_s23  ;;  %s426_s24 = scalar_lea.vmem [#allocation10], %s3152_s23 }
  0xe2   : > { %s3161_s22 = scalar_lea.vmem [#allocation11], %s2061_s18  ;;  %s3163_s20 = scalar_lea.vmem [#allocation12], %s2062_s8 }
  0xe3   : > { %p2063_p1 = scmp.ne.s32.totalorder %s2766_s27, 0 }
  0xe4   : > { %v498_v0 = vld [vmem:[#allocation3] sm:$0xff] (!%p2063_p1)  ;;  %vm500_vm0 = vcmask (!%p2063_p1), 261120   ;;  %v499_v1 = vld [vmem:[#allocation3 + $0x8] sm:$0xff] (!%p2063_p1) }
  0xe5   : > { %497 = sbr.rel (%p2063_p1) target bundleno = 236 (0xec), region = 80  ;;  %501 = vst.msk [vmem:[#allocation13] sm:$0xff] (!%p2063_p1), %vm500_vm0, %v498_v0  ;;  %502 = vst.msk [vmem:[#allocation13 + $0x8] sm:$0xff] (!%p2063_p1), %vm500_vm0, %v499_v1 }
  0xec PF: > { %v3166_v2 = vld [vmem:[#allocation13] sm:$0xff]  ;;  %vm506_vm1 = vcmask 261120   ;;  %v3168_v3 = vld [vmem:[#allocation13 + $0x8] sm:$0xff]  ;;  %v2787_v17 = vmov 0.0   ;;  %vm2788_vm2 = vmmov 0   ;;  %v534_v23 = vlaneseq  ;;  %v3194_v28 = vld [vmem:[%s3163_s20] sm:$0xff] }
  0xed   : > { %v507_v4 = vsel %vm506_vm1, %v3166_v2, 0.0  ;;  %v510_v5 = vsel %vm506_vm1, %v3168_v3, 0.0  ;;  %v2422_v16 = vld [vmem:[%s408_s17] sm:$0xff]   ;;  %2155 = vmatprep.subr.bf16.mxu0 %v2787_v17  ;;  %2175 = vmatprep.subr.bf16.mxu1 %v2787_v17  ;;  %v2423_v18 = vld [vmem:[%s408_s17 + $0x8] sm:$0xff]   ;;  %s2789_s27 = smov 96   ;;  %v2790_v52 = vmov 0  }
  0xee   : > { %508 = vadd.xlane.f32.xlu0 %v507_v4  ;;  %2156 = vmatpush3.bf16.msra.mxu0 %v2422_v16  ;;  %v3190_v26 = vshrl.u32 %v534_v23, 7  ;;  %v613_v51 = vld [vmem:[#allocation6] sm:$0xff]  ;;  %v614_v53 = vld [vmem:[#allocation6 + $0x8] sm:$0xff]  ;;  %vm618_vm3 = vcmask 64512   ;;  %s2791_s9 = smov 64   ;;  %s2792_s13 = smov 88  }
  0xef   : > { %2159 = vmatprep.mubr.msk.bf16.mxu0 %vm2788_vm2, %v2787_v17  ;;  %2157 = vmatprep.subr.bf16.mxu0 %v2787_v17  ;;  %s2793_s16 = smov 120   ;;  %vm757_vm4 = vcmask 1043456   ;;  %s2794_s19 = smov 56   ;;  %vm1083_vm5 = vcmask 130112   ;;  %vm1318_vm6 = vcmask 195712   ;;  %vm1553_vm7 = vcmask 261312  }
  0xf0   : > { %2177 = vmatprep.mubr.msk.bf16.mxu1 %vm2788_vm2, %v2787_v17  ;;  %v536_v27 = vsub.s32 0, %v3190_v26  ;;  %v542_v32 = vsub.s32 1, %v3190_v26  ;;  %v553_v41 = vsub.s32 6, %v3190_v26  ;;  %2420 = vset.pattern.permute.xlu1 %v2790_v52  ;;  %s2795_s3 = smov 80   ;;  %s2796_s12 = smov 112  }
  0xf1   : > { %2421 = vset.pattern.permute.xlu0 %v2790_v52  ;;  %s2797_s26 = smov 48   ;;  %s2798_s15 = smov 72  }
  0xf2   : > { %511 = vadd.xlane.f32.xlu0 %v510_v5  ;;  %2158 = vmatpush3.bf16.msra.mxu0 %v2423_v18  ;;  %v537_v31 = vrot.slane %v3194_v28, %v536_v27  ;;  %v543_v36 = vrot.slane %v3194_v28, %v542_v32  ;;  %v554_v42 = vrot.slane %v3194_v28, %v553_v41  ;;  %s2799_s0 = smov 104   ;;  %s2800_s11 = smov 40  }
  0xf3   : > { %2163 = vmatprep.subr.bf16.mxu0 %v2787_v17  ;;  %s2801_s14 = smov 8   ;;  %s2802_s21 = smov 16  }
  0xf4   : > { %s2803_s10 = smov 24   ;;  %s2804_s23 = smov [#allocation13]  }
  0xf5   : > { %s1869_s17 = sshll.u32 %s2804_s23, 4  ;;  %p2345_p5 = scmp.eq.s32.totalorder %s2875_s30, 1  ;;  %s1870_s17 = int_to_ptr.vmem [resolvable:$true] %s1869_s17 }
  0xf6   : > { %s2686_s18 = scalar_lea.vmem %s1870_s17, 256  ;;  %p2693_p7 = scmp.lt.s32.totalorder %s1870_s17, %s1870_s17 }
  0xf7   : > { %p2687_p11 = scmp.ne.s32.totalorder %s1870_s17, %s2686_s18  ;;  %p2694_p0 = scmp.lt.s32.totalorder %s2686_s18, %s2686_s18 }
  0xf9   : > { %p2688_p4 = pnand %p2687_p11, %p2345_p5  ;;  %p2695_p2 = por %p2694_p0, %p2693_p7 }
  0xfb   : > { %p2689_p12 = pneg %p2688_p4 }
  0xfd   : > { %p2696_p9 = pnand %p2695_p2, %p2689_p12 }
 0x17b   : > { %v509_v6 = vpop.xlane.xlu0 %508 }
 0x17c   : > { %v514_v7 = vmul.f32 0.03125, %v509_v6 }
 0x17e   : > { %v516_v8 = vsub.f32 %v3166_v2, %v514_v7 }
 0x17f   : > { %v512_v9 = vpop.xlane.xlu0 %511 }
 0x180   : > { %v515_v10 = vmul.f32 0.03125, %v512_v9  ;;  %v518_v11 = vmul.f32 %v516_v8, %v516_v8 }
 0x182   : > { %v517_v12 = vsub.f32 %v3168_v3, %v515_v10  ;;  %v520_v13 = vsel %vm506_vm1, %v518_v11, 0.0 }
 0x183   : > { %521 = vadd.xlane.f32.xlu1 %v520_v13 }
 0x184   : > { %v519_v14 = vmul.f32 %v517_v12, %v517_v12 }
 0x186   : > { %v523_v15 = vsel %vm506_vm1, %v519_v14, 0.0 }
 0x187   : > { %524 = vadd.xlane.f32.xlu1 %v523_v15 }
 0x210   : > { %v522_v19 = vpop.xlane.xlu1 %521 }
 0x211   : > { %v526_v20 = vmul.f32 0.03125, %v522_v19 }
 0x213   : > { %v528_v21 = vadd.f32 1e-12, %v526_v20 }
 0x214   : > { %v525_v22 = vpop.xlane.xlu1 %524 }
 0x215   : > { %2436 = vrsqrt.f32 %v528_v21  ;;  %v527_v24 = vmul.f32 0.03125, %v525_v22 }
 0x217   : > { %v529_v25 = vadd.f32 1e-12, %v527_v24 }
 0x219   : > { %2438 = vrsqrt.f32 %v529_v25 }
 0x21f   : > { %v2437_v29 = vpop.eup %2436 }
 0x220   : > { %v532_v30 = vmul.f32 %v2437_v29, %v516_v8 }
 0x222   : > { %v538_v35 = vmul.f32 %v537_v31, %v532_v30 }
 0x223   : > { %v2439_v33 = vpop.eup %2438 }
 0x224   : > { %v533_v34 = vmul.f32 %v2439_v33, %v517_v12  ;;  %v544_v38 = vadd.f32 %v543_v36, %v538_v35 }
 0x226   : > { %v539_v37 = vmul.f32 %v537_v31, %v533_v34 }
 0x228   : > { %v545_v39 = vadd.f32 %v543_v36, %v539_v37 }
 0x22a   : > { %v546_v40 = vpack.c.bf16 %v545_v39, %v544_v38 }
 0x22c   : > { %2160 = vmatmul.mubr.msk.bf16.vlgmr.msra.gmra.mrb[0].mxu0 %vm506_vm1, %v546_v40 }
 0x22d   : > { %2165 = vmatprep.mubr.msk.bf16.mxu0 %vm2788_vm2, %v2787_v17 }
 0x2ff   : > { %v604_v43 = vpop.f32.mrb[0].mxu0 }
 0x300   : > { %v605_v44 = vadd.f32 %v604_v43, %v554_v42  ;;  %v2161_v45 = vpop.f32.mrb[1].mxu0 }
 0x301   : > { %v607_v46 = vpop.f32.mrb[2].mxu0 }
 0x302   : > { %v3204_v47 = vpack.c.bf16 %v605_v44, %v605_v44  ;;  %v608_v48 = vadd.f32 %v607_v46, %v554_v42  ;;  %v2162_v49 = vpop.f32.mrb[3].mxu0 }
 0x304   : > { %v3206_v50 = vpack.c.bf16 %v608_v48, %v608_v48  ;;  %616 = vrot.lane.b32.xlu0 %v3204_v47, %s2789_s27 }
 0x306   : > { %666 = vrot.lane.b32.xlu1 %v3206_v50, %s2789_s27 }
 0x30a   : > { %718 = vperm.xlu1 %2420, %v613_v51  }
 0x30e   : > { %723 = vperm.xlu1 %2420, %v614_v53  }
 0x376   : > { %v617_v54 = vpop.permute.xlu0 %616 }
 0x377   : > { %v623_v55 = vsel %vm618_vm3, %v617_v54, 0 }
 0x378   : > { %2164 = vmatpush3.bf16.xpose.msra.mxu0 %v623_v55  ;;  %v667_v56 = vpop.permute.xlu1 %666 }
 0x379   : > { %2169 = vmatprep.subr.bf16.mxu0 %v2787_v17  ;;  %v672_v57 = vsel %vm618_vm3, %v667_v56, 0 }
 0x37f   : > { %2166 = vmatmul.mubr.msk.bf16.vlgmr.msra.gmra.mrb[4].mxu0 %vm618_vm3, %v3204_v47 }
 0x380   : > { %2170 = vmatpush3.bf16.xpose.msra.mxu0 %v672_v57  ;;  %2171 = vmatprep.mubr.msk.bf16.mxu0 %vm2788_vm2, %v2787_v17 }
 0x381   : > { %2181 = vmatprep.subr.bf16.mxu0 %v2787_v17 }
 0x387   : > { %2172 = vmatmul.mubr.msk.bf16.vlgmr.msra.gmra.mrb[8].mxu0 %vm618_vm3, %v3206_v50 }
 0x388   : > { %2183 = vmatprep.mubr.msk.bf16.mxu0 %vm2788_vm2, %v2787_v17 }
 0x389   : > { %v3222_v59 = vpop.permute.xlu1 %718 }
 0x38d   : > { %v3226_v7 = vpop.permute.xlu1 %723 }
 0x452   : > { %v659_v58 = vpop.f32.mrb[4].mxu0 }
 0x453   : > { %v714_v60 = vmul.f32 0.35355338, %v659_v58  ;;  %v2167_v61 = vpop.f32.mrb[5].mxu0 }
 0x454   : > { %v662_v62 = vpop.f32.mrb[6].mxu0 }
 0x455   : > { %v2168_v63 = vpop.f32.mrb[7].mxu0  ;;  %v726_v0 = vadd.f32 %v3222_v59, %v714_v60 }
 0x457   : > { %v728_v1 = vsel %vm618_vm3, %v726_v0, -inf }
 0x458   : > { %729 = vmax.xlane.f32.xlu0 %v728_v1 }
 0x45a   : > { %v708_v4 = vpop.f32.mrb[8].mxu0 }
 0x45b   : > { %v715_v5 = vmul.f32 0.35355338, %v708_v4  ;;  %v2173_v6 = vpop.f32.mrb[9].mxu0 }
 0x45c   : > { %v711_v8 = vpop.f32.mrb[10].mxu0 }
 0x45d   : > { %v2174_v9 = vpop.f32.mrb[11].mxu0  ;;  %v727_v10 = vadd.f32 %v3226_v7, %v715_v5 }
 0x45f   : > { %v731_v11 = vsel %vm618_vm3, %v727_v10, -inf }
 0x460   : > { %732 = vmax.xlane.f32.xlu1 %v731_v11 }
 0x471   : > { %801 = vrot.lane.b32.xlu1 %v3206_v50, %s2791_s9 }
 0x475   : > { %853 = vrot.lane.b32.xlu1 %v3204_v47, %s2792_s13 }
 0x479   : > { %903 = vrot.lane.b32.xlu1 %v3206_v50, %s2792_s13 }
 0x47d   : > { %901 = vrot.lane.b32.xlu1 %v3206_v50, %s2793_s16 }
 0x4e5   : > { %v730_v12 = vpop.xlane.xlu0 %729 }
 0x4e6   : > { %v734_v13 = vsub.f32 %v726_v0, %v730_v12 }
 0x4e8   : > { %v736_v14 = vmul.f32 1.442695, %v734_v13 }
 0x4ea   : > { %2440 = vpow2.f32 %v736_v14 }
 0x4ed   : > { %v733_v15 = vpop.xlane.xlu1 %732 }
 0x4ee   : > { %v735_v16 = vsub.f32 %v727_v10, %v733_v15 }
 0x4f0   : > { %v738_v18 = vmul.f32 1.442695, %v735_v16 }
 0x4f1   : > { %v802_v19 = vpop.permute.xlu1 %801 }
 0x4f2   : > { %2442 = vpow2.f32 %v738_v18  ;;  %v807_v20 = vsel %vm757_vm4, %v802_v19, 0 }
 0x4f3   : > { %2182 = vmatpush3.bf16.msra.mxu0 %v807_v20 }
 0x4f4   : > { %v2441_v21 = vpop.eup %2440  ;;  %2193 = vmatprep.subr.bf16.mxu0 %v2787_v17 }
 0x4f5   : > { %v740_v22 = vsel %vm618_vm3, %v2441_v21, 0.0  ;;  %v854_v34 = vpop.permute.xlu1 %853 }
 0x4f6   : > { %741 = vadd.xlane.f32.xlu0 %v740_v22  ;;  %v859_v38 = vsel %vm618_vm3, %v854_v34, 0 }
 0x4f9   : > { %v904_v37 = vpop.permute.xlu1 %903 }
 0x4fa   : > { %v909_v40 = vsel %vm618_vm3, %v904_v37, 0 }
 0x4fc   : > { %v2443_v23 = vpop.eup %2442 }
 0x4fd   : > { %v743_v24 = vsel %vm618_vm3, %v2443_v23, 0.0  ;;  %v902_v42 = vpop.permute.xlu1 %901 }
 0x4fe   : > { %744 = vadd.xlane.f32.xlu0 %v743_v24 }
 0x514   : > { %752 = vrot.lane.b32.xlu0 %v3204_v47, %s2791_s9 }
 0x518   : > { %851 = vrot.lane.b32.xlu0 %v3204_v47, %s2793_s16 }
 0x583   : > { %v742_v25 = vpop.xlane.xlu0 %741 }
 0x584   : > { %2444 = vrcp.f32 %v742_v25 }
 0x58b   : > { %v745_v27 = vpop.xlane.xlu0 %744 }
 0x58c   : > { %2446 = vrcp.f32 %v745_v27 }
 0x58e   : > { %v2445_v29 = vpop.eup %2444 }
 0x58f   : > { %v753_v30 = vpop.permute.xlu0 %752  ;;  %v748_v31 = vmul.f32 %v2445_v29, %v2441_v21 }
 0x590   : > { %v759_v32 = vsel %vm757_vm4, %v753_v30, 0 }
 0x591   : > { %2176 = vmatpush3.bf16.msra.mxu1 %v759_v32  ;;  %v750_v33 = vpack.c.bf16 %v748_v31, %v748_v31 }
 0x592   : > { %2187 = vmatprep.subr.bf16.mxu1 %v2787_v17 }
 0x593   : > { %v852_v41 = vpop.permute.xlu0 %851 }
 0x594   : > { %2178 = vmatmul.mubr.msk.bf16.vlgmr.msra.gmra.mrb[0].mxu1 %vm618_vm3, %v750_v33 }
 0x595   : > { %2189 = vmatprep.mubr.msk.bf16.mxu1 %vm2788_vm2, %v2787_v17 }
 0x596   : > { %v2447_v35 = vpop.eup %2446 }
 0x597   : > { %v749_v36 = vmul.f32 %v2447_v35, %v2443_v23 }
 0x599   : > { %v751_v39 = vpack.c.bf16 %v749_v36, %v749_v36 }
 0x59a   : > { %2188 = vmatpush3.bf16.xpose.msra.mxu1 %v859_v38 }
 0x59b   : > { %2184 = vmatmul.mubr.msk.bf16.vlgmr.msra.gmra.mrb[12].mxu0 %vm618_vm3, %v751_v39  ;;  %2199 = vmatprep.subr.bf16.mxu1 %v2787_v17 }
 0x59c   : > { %2194 = vmatpush3.bf16.xpose.msra.mxu0 %v909_v40  ;;  %2195 = vmatprep.mubr.msk.bf16.mxu0 %vm2788_vm2, %v2787_v17 }
 0x59d   : > { %2205 = vmatprep.subr.bf16.mxu0 %v2787_v17 }
 0x5a1   : > { %2190 = vmatmul.mubr.msk.bf16.vlgmr.msra.gmra.mrb[4].mxu1 %vm618_vm3, %v852_v41 }
 0x5a2   : > { %2201 = vmatprep.mubr.msk.bf16.mxu1 %vm2788_vm2, %v2787_v17 }
 0x5a3   : > { %2196 = vmatmul.mubr.msk.bf16.vlgmr.msra.gmra.mrb[16].mxu0 %vm618_vm3, %v902_v42 }
 0x5a4   : > { %2207 = vmatprep.mubr.msk.bf16.mxu0 %vm2788_vm2, %v2787_v17 }
 0x667   : > { %v795_v43 = vpop.f32.mrb[0].mxu1 }
 0x668   : > { %849 = vst.msk [vmem:[#allocation2] sm:$0xff] %vm618_vm3, %v795_v43  ;;  %v2179_v44 = vpop.f32.mrb[1].mxu1 }
 0x669   : > { %v798_v45 = vpop.f32.mrb[2].mxu1 }
 0x66a   : > { %v2180_v46 = vpop.f32.mrb[3].mxu1 }
 0x66e   : > { %v843_v48 = vpop.f32.mrb[12].mxu0 }
 0x66f   : > { %850 = vst.msk [vmem:[#allocation2 + $0x8] sm:$0xff] %vm618_vm3, %v843_v48  ;;  %v2185_v49 = vpop.f32.mrb[13].mxu0 }
 0x670   : > { %v846_v51 = vpop.f32.mrb[14].mxu0 }
 0x671   : > { %v2186_v52 = vpop.f32.mrb[15].mxu0 }
 0x674   : > { %v895_v53 = vpop.f32.mrb[4].mxu1 }
 0x675   : > { %v951_v54 = vmul.f32 0.35355338, %v895_v53  ;;  %v2191_v55 = vpop.f32.mrb[5].mxu1 }
 0x676   : > { %v898_v56 = vpop.f32.mrb[6].mxu1  ;;  %v945_v57 = vpop.f32.mrb[16].mxu0 }
 0x677   : > { %v952_v58 = vmul.f32 0.35355338, %v945_v57  ;;  %v2192_v60 = vpop.f32.mrb[7].mxu1  ;;  %v2197_v61 = vpop.f32.mrb[17].mxu0  ;;  %v953_v62 = vadd.f32 %v951_v54, %v3222_v59 }
 0x678   : > { %v948_v63 = vpop.f32.mrb[18].mxu0 }
 0x679   : > { %v2198_v0 = vpop.f32.mrb[19].mxu0  ;;  %v955_v1 = vsel %vm618_vm3, %v953_v62, -inf  ;;  %v954_v4 = vadd.f32 %v952_v58, %v3226_v7 }
 0x67a   : > { %956 = vmax.xlane.f32.xlu0 %v955_v1 }
 0x67b   : > { %v958_v5 = vsel %vm618_vm3, %v954_v4, -inf }
 0x67c   : > { %959 = vmax.xlane.f32.xlu1 %v958_v5 }
 0x68d   : > { %1027 = vrot.lane.b32.xlu1 %v3206_v50, %s2794_s19 }
 0x691   : > { %1088 = vrot.lane.b32.xlu1 %v3204_v47, %s2795_s3 }
 0x695   : > { %1138 = vrot.lane.b32.xlu1 %v3206_v50, %s2795_s3 }
 0x699   : > { %1136 = vrot.lane.b32.xlu1 %v3206_v50, %s2796_s12 }
 0x707   : > { %v957_v6 = vpop.xlane.xlu0 %956 }
 0x708   : > { %v961_v8 = vsub.f32 %v953_v62, %v957_v6 }
 0x709   : > { %v960_v9 = vpop.xlane.xlu1 %959 }
 0x70a   : > { %v963_v10 = vmul.f32 1.442695, %v961_v8  ;;  %v962_v11 = vsub.f32 %v954_v4, %v960_v9 }
 0x70c   : > { %2448 = vpow2.f32 %v963_v10  ;;  %v965_v12 = vmul.f32 1.442695, %v962_v11 }
 0x70d   : > { %v1028_v13 = vpop.permute.xlu1 %1027 }
 0x70e   : > { %2450 = vpow2.f32 %v965_v12  ;;  %v1033_v14 = vsel %vm757_vm4, %v1028_v13, 0 }
 0x70f   : > { %2206 = vmatpush3.bf16.msra.mxu0 %v1033_v14 }
 0x710   : > { %2217 = vmatprep.subr.bf16.mxu0 %v2787_v17 }
 0x711   : > { %v1089_v25 = vpop.permute.xlu1 %1088 }
 0x712   : > { %v1094_v33 = vsel %vm618_vm3, %v1089_v25, 0 }
 0x715   : > { %v1139_v32 = vpop.permute.xlu1 %1138 }
 0x716   : > { %v2449_v15 = vpop.eup %2448  ;;  %v1144_v35 = vsel %vm618_vm3, %v1139_v32, 0 }
 0x717   : > { %v967_v16 = vsel %vm618_vm3, %v2449_v15, 0.0 }
 0x718   : > { %v2451_v18 = vpop.eup %2450  ;;  %968 = vadd.xlane.f32.xlu0 %v967_v16 }
 0x719   : > { %v970_v19 = vsel %vm618_vm3, %v2451_v18, 0.0  ;;  %v1137_v37 = vpop.permute.xlu1 %1136 }
 0x71c   : > { %971 = vadd.xlane.f32.xlu0 %v970_v19 }
 0x732   : > { %979 = vrot.lane.b32.xlu0 %v3204_v47, %s2794_s19 }
 0x736   : > { %1086 = vrot.lane.b32.xlu0 %v3204_v47, %s2796_s12 }
 0x7a5   : > { %v969_v20 = vpop.xlane.xlu0 %968 }
 0x7a6   : > { %2452 = vrcp.f32 %v969_v20 }
 0x7a9   : > { %v972_v21 = vpop.xlane.xlu0 %971 }
 0x7aa   : > { %2454 = vrcp.f32 %v972_v21 }
 0x7ad   : > { %v980_v22 = vpop.permute.xlu0 %979 }
 0x7ae   : > { %v985_v23 = vsel %vm757_vm4, %v980_v22, 0 }
 0x7af   : > { %2200 = vmatpush3.bf16.msra.mxu1 %v985_v23 }
 0x7b0   : > { %v2453_v24 = vpop.eup %2452  ;;  %2211 = vmatprep.subr.bf16.mxu1 %v2787_v17 }
 0x7b1   : > { %v975_v27 = vmul.f32 %v2453_v24, %v2449_v15  ;;  %v1087_v36 = vpop.permute.xlu0 %1086 }
 0x7b3   : > { %v977_v29 = vpack.c.bf16 %v975_v27, %v975_v27 }
 0x7b4   : > { %v2455_v30 = vpop.eup %2454 }
 0x7b5   : > { %v976_v31 = vmul.f32 %v2455_v30, %v2451_v18  ;;  %2202 = vmatmul.mubr.msk.bf16.vlgmr.msra.gmra.mrb[8].mxu1 %vm618_vm3, %v977_v29 }
 0x7b6   : > { %2213 = vmatprep.mubr.msk.bf16.mxu1 %vm2788_vm2, %v2787_v17 }
 0x7b7   : > { %v978_v34 = vpack.c.bf16 %v976_v31, %v976_v31 }
 0x7b8   : > { %2212 = vmatpush3.bf16.xpose.msra.mxu1 %v1094_v33 }
 0x7b9   : > { %2208 = vmatmul.mubr.msk.bf16.vlgmr.msra.gmra.mrb[20].mxu0 %vm618_vm3, %v978_v34  ;;  %2223 = vmatprep.subr.bf16.mxu1 %v2787_v17 }
 0x7ba   : > { %2218 = vmatpush3.bf16.xpose.msra.mxu0 %v1144_v35  ;;  %2219 = vmatprep.mubr.msk.bf16.mxu0 %vm2788_vm2, %v2787_v17 }
 0x7bb   : > { %2229 = vmatprep.subr.bf16.mxu0 %v2787_v17 }
 0x7bf   : > { %2214 = vmatmul.mubr.msk.bf16.vlgmr.msra.gmra.mrb[12].mxu1 %vm618_vm3, %v1087_v36 }
 0x7c0   : > { %2225 = vmatprep.mubr.msk.bf16.mxu1 %vm2788_vm2, %v2787_v17 }
 0x7c1   : > { %2220 = vmatmul.mubr.msk.bf16.vlgmr.msra.gmra.mrb[24].mxu0 %vm618_vm3, %v1137_v37 }
 0x7c2   : > { %2231 = vmatprep.mubr.msk.bf16.mxu0 %vm2788_vm2, %v2787_v17 }
 0x888   : > { %v3292_v38 = vpop.f32.mrb[8].mxu1 }
 0x889   : > { %v2203_v39 = vpop.f32.mrb[9].mxu1 }
 0x88a   : > { %v1024_v40 = vpop.f32.mrb[10].mxu1 }
 0x88b   : > { %v2204_v41 = vpop.f32.mrb[11].mxu1 }
 0x88c   : > { %v3294_v42 = vpop.f32.mrb[20].mxu0 }
 0x88d   : > { %v2209_v43 = vpop.f32.mrb[21].mxu0 }
 0x88e   : > { %v1072_v44 = vpop.f32.mrb[22].mxu0 }
 0x88f   : > { %v2210_v45 = vpop.f32.mrb[23].mxu0 }
 0x892   : > { %v1130_v46 = vpop.f32.mrb[12].mxu1 }
 0x893   : > { %v1186_v48 = vmul.f32 0.35355338, %v1130_v46  ;;  %v2215_v49 = vpop.f32.mrb[13].mxu1 }
 0x894   : > { %v1133_v51 = vpop.f32.mrb[14].mxu1  ;;  %v1180_v52 = vpop.f32.mrb[24].mxu0 }
 0x895   : > { %v1187_v53 = vmul.f32 0.35355338, %v1180_v52  ;;  %v2216_v54 = vpop.f32.mrb[15].mxu1  ;;  %v2221_v55 = vpop.f32.mrb[25].mxu0  ;;  %v1188_v56 = vadd.f32 %v1186_v48, %v3222_v59 }
 0x896   : > { %v1183_v57 = vpop.f32.mrb[26].mxu0 }
 0x897   : > { %v2222_v58 = vpop.f32.mrb[27].mxu0  ;;  %v1190_v60 = vsel %vm618_vm3, %v1188_v56, -inf  ;;  %v1189_v61 = vadd.f32 %v1187_v53, %v3226_v7 }
 0x898   : > { %1191 = vmax.xlane.f32.xlu0 %v1190_v60 }
 0x899   : > { %v1193_v62 = vsel %vm618_vm3, %v1189_v61, -inf }
 0x89a   : > { %1194 = vmax.xlane.f32.xlu1 %v1193_v62 }
 0x8ab   : > { %1262 = vrot.lane.b32.xlu1 %v3206_v50, %s2797_s26 }
 0x8af   : > { %1323 = vrot.lane.b32.xlu1 %v3204_v47, %s2798_s15 }
 0x8b3   : > { %1373 = vrot.lane.b32.xlu1 %v3206_v50, %s2798_s15 }
 0x8b7   : > { %1371 = vrot.lane.b32.xlu1 %v3206_v50, %s2799_s0 }
 0x925   : > { %v1192_v63 = vpop.xlane.xlu0 %1191 }
 0x926   : > { %v1196_v0 = vsub.f32 %v1188_v56, %v1192_v63 }
 0x927   : > { %v1195_v1 = vpop.xlane.xlu1 %1194 }
 0x928   : > { %v1198_v4 = vmul.f32 1.442695, %v1196_v0  ;;  %v1197_v5 = vsub.f32 %v1189_v61, %v1195_v1 }
 0x92a   : > { %2456 = vpow2.f32 %v1198_v4  ;;  %v1200_v6 = vmul.f32 1.442695, %v1197_v5 }
 0x92b   : > { %v1263_v8 = vpop.permute.xlu1 %1262 }
 0x92c   : > { %2458 = vpow2.f32 %v1200_v6  ;;  %v1268_v9 = vsel %vm757_vm4, %v1263_v8, 0 }
 0x92d   : > { %2230 = vmatpush3.bf16.msra.mxu0 %v1268_v9 }
 0x92e   : > { %2241 = vmatprep.subr.bf16.mxu0 %v2787_v17 }
 0x92f   : > { %v1324_v20 = vpop.permute.xlu1 %1323 }
 0x930   : > { %v1329_v27 = vsel %vm618_vm3, %v1324_v20, 0  ;;  %v2424_v20 = vld [vmem:[%s417_s2] sm:$0xff]  }
 0x933   : > { %v1374_v25 = vpop.permute.xlu1 %1373 }
 0x934   : > { %v2457_v10 = vpop.eup %2456  ;;  %v1379_v30 = vsel %vm618_vm3, %v1374_v25, 0 }
 0x935   : > { %v1202_v11 = vsel %vm618_vm3, %v2457_v10, 0.0 }
 0x936   : > { %v2459_v12 = vpop.eup %2458  ;;  %1203 = vadd.xlane.f32.xlu0 %v1202_v11 }
 0x937   : > { %v1205_v13 = vsel %vm618_vm3, %v2459_v12, 0.0  ;;  %v1372_v32 = vpop.permute.xlu1 %1371 }
 0x93a   : > { %1206 = vadd.xlane.f32.xlu0 %v1205_v13 }
 0x950   : > { %1214 = vrot.lane.b32.xlu0 %v3204_v47, %s2797_s26 }
 0x954   : > { %1321 = vrot.lane.b32.xlu0 %v3204_v47, %s2799_s0 }
 0x9c3   : > { %v1204_v14 = vpop.xlane.xlu0 %1203 }
 0x9c4   : > { %2460 = vrcp.f32 %v1204_v14 }
 0x9c7   : > { %v1207_v15 = vpop.xlane.xlu0 %1206 }
 0x9c8   : > { %2462 = vrcp.f32 %v1207_v15 }
 0x9cb   : > { %v1215_v16 = vpop.permute.xlu0 %1214 }
 0x9cc   : > { %v1220_v18 = vsel %vm757_vm4, %v1215_v16, 0 }
 0x9cd   : > { %2224 = vmatpush3.bf16.msra.mxu1 %v1220_v18 }
 0x9ce   : > { %v2461_v19 = vpop.eup %2460  ;;  %2235 = vmatprep.subr.bf16.mxu1 %v2787_v17 }
 0x9cf   : > { %v1210_v21 = vmul.f32 %v2461_v19, %v2457_v10  ;;  %v1322_v31 = vpop.permute.xlu0 %1321 }
 0x9d1   : > { %v1212_v22 = vpack.c.bf16 %v1210_v21, %v1210_v21  ;;  %v2425_v21 = vld [vmem:[%s417_s2 + $0x8] sm:$0xff]  }
 0x9d2   : > { %v2463_v23 = vpop.eup %2462 }
 0x9d3   : > { %v1211_v24 = vmul.f32 %v2463_v23, %v2459_v12  ;;  %2226 = vmatmul.mubr.msk.bf16.vlgmr.msra.gmra.mrb[16].mxu1 %vm618_vm3, %v1212_v22 }
 0x9d4   : > { %2237 = vmatprep.mubr.msk.bf16.mxu1 %vm2788_vm2, %v2787_v17 }
 0x9d5   : > { %v1213_v29 = vpack.c.bf16 %v1211_v24, %v1211_v24 }
 0x9d6   : > { %2236 = vmatpush3.bf16.xpose.msra.mxu1 %v1329_v27 }
 0x9d7   : > { %2232 = vmatmul.mubr.msk.bf16.vlgmr.msra.gmra.mrb[28].mxu0 %vm618_vm3, %v1213_v29  ;;  %2247 = vmatprep.subr.bf16.mxu1 %v2787_v17 }
 0x9d8   : > { %2242 = vmatpush3.bf16.xpose.msra.mxu0 %v1379_v30  ;;  %2243 = vmatprep.mubr.msk.bf16.mxu0 %vm2788_vm2, %v2787_v17 }
 0x9d9   : > { %2253 = vmatprep.subr.bf16.mxu0 %v2787_v17 }
 0x9dd   : > { %2238 = vmatmul.mubr.msk.bf16.vlgmr.msra.gmra.mrb[20].mxu1 %vm618_vm3, %v1322_v31 }
 0x9de   : > { %2249 = vmatprep.mubr.msk.bf16.mxu1 %vm2788_vm2, %v2787_v17 }
 0x9df   : > { %2244 = vmatmul.mubr.msk.bf16.vlgmr.msra.gmra.mrb[32].mxu0 %vm618_vm3, %v1372_v32 }
 0x9e0   : > { %2255 = vmatprep.mubr.msk.bf16.mxu0 %vm2788_vm2, %v2787_v17 }
 0xaa6   : > { %v1256_v33 = vpop.f32.mrb[16].mxu1 }
 0xaa7   : > { %v2227_v34 = vpop.f32.mrb[17].mxu1 }
 0xaa8   : > { %v1259_v35 = vpop.f32.mrb[18].mxu1 }
 0xaa9   : > { %v2228_v36 = vpop.f32.mrb[19].mxu1 }
 0xaaa   : > { %v1304_v37 = vpop.f32.mrb[28].mxu0 }
 0xaab   : > { %v2233_v39 = vpop.f32.mrb[29].mxu0 }
 0xaac   : > { %v1307_v40 = vpop.f32.mrb[30].mxu0 }
 0xaad   : > { %v2234_v41 = vpop.f32.mrb[31].mxu0 }
 0xab0   : > { %v1365_v43 = vpop.f32.mrb[20].mxu1 }
 0xab1   : > { %v1421_v44 = vmul.f32 0.35355338, %v1365_v43  ;;  %v2239_v45 = vpop.f32.mrb[21].mxu1 }
 0xab2   : > { %v1368_v46 = vpop.f32.mrb[22].mxu1  ;;  %v1415_v48 = vpop.f32.mrb[32].mxu0 }
 0xab3   : > { %v1422_v49 = vmul.f32 0.35355338, %v1415_v48  ;;  %v2240_v51 = vpop.f32.mrb[23].mxu1  ;;  %v2245_v52 = vpop.f32.mrb[33].mxu0  ;;  %v1423_v53 = vadd.f32 %v1421_v44, %v3222_v59 }
 0xab4   : > { %v1418_v54 = vpop.f32.mrb[34].mxu0 }
 0xab5   : > { %v2246_v55 = vpop.f32.mrb[35].mxu0  ;;  %v1425_v56 = vsel %vm618_vm3, %v1423_v53, -inf  ;;  %v1424_v57 = vadd.f32 %v1422_v49, %v3226_v7 }
 0xab6   : > { %1426 = vmax.xlane.f32.xlu0 %v1425_v56 }
 0xab7   : > { %v1428_v58 = vsel %vm618_vm3, %v1424_v57, -inf }
 0xab8   : > { %1429 = vmax.xlane.f32.xlu1 %v1428_v58 }
 0xac9   : > { %1497 = vrot.lane.b32.xlu1 %v3206_v50, %s2800_s11 }
 0xacd   : > { %1077 = vrot.lane.b32.xlu1 %v3292_v38, %s2801_s14 }
 0xad1   : > { %1079 = vrot.lane.b32.xlu1 %v3294_v42, %s2801_s14 }
 0xad5   : > { %1314 = vrot.lane.b32.xlu1 %v1304_v37, %s2802_s21  ;;  %v1565_v37 = vsub.s32 2, %v3190_v26 }
 0xad7   : > { %v1566_v39 = vrot.slane %v3194_v28, %v1565_v37 }
 0xb43   : > { %v1427_v59 = vpop.xlane.xlu0 %1426 }
 0xb44   : > { %v1431_v60 = vsub.f32 %v1423_v53, %v1427_v59 }
 0xb45   : > { %v1430_v7 = vpop.xlane.xlu1 %1429 }
 0xb46   : > { %v1433_v61 = vmul.f32 1.442695, %v1431_v60  ;;  %v1432_v62 = vsub.f32 %v1424_v57, %v1430_v7  ;;  %v2426_v7 = vld [vmem:[%s426_s24] sm:$0xff]  }
 0xb48   : > { %2464 = vpow2.f32 %v1433_v61  ;;  %v1435_v63 = vmul.f32 1.442695, %v1432_v62  ;;  %v2427_v61 = vld [vmem:[%s426_s24 + $0x8] sm:$0xff]  }
 0xb49   : > { %v1498_v0 = vpop.permute.xlu1 %1497 }
 0xb4a   : > { %2466 = vpow2.f32 %v1435_v63  ;;  %v1503_v50 = vsel %vm757_vm4, %v1498_v0, 0 }
 0xb4b   : > { %2254 = vmatpush3.bf16.msra.mxu0 %v1503_v50 }
 0xb4c   : > { %2267 = vmatprep.subr.bf16.mxu0 %v2787_v17 }
 0xb4d   : > { %v1078_v38 = vpop.permute.xlu1 %1077 }
 0xb4e   : > { %1084 = vst.msk [vmem:[#allocation2] sm:$0xff] %vm1083_vm5, %v1078_v38 }
 0xb51   : > { %v1080_v42 = vpop.permute.xlu1 %1079 }
 0xb52   : > { %v2465_v1 = vpop.eup %2464  ;;  %1085 = vst.msk [vmem:[#allocation2 + $0x8] sm:$0xff] %vm1083_vm5, %v1080_v42 }
 0xb53   : > { %v1437_v4 = vsel %vm618_vm3, %v2465_v1, 0.0 }
 0xb54   : > { %v2467_v5 = vpop.eup %2466  ;;  %1438 = vadd.xlane.f32.xlu0 %v1437_v4 }
 0xb55   : > { %v1315_v6 = vpop.permute.xlu1 %1314  ;;  %v1440_v8 = vsel %vm618_vm3, %v2467_v5, 0.0 }
 0xb56   : > { %1320 = vst.msk [vmem:[#allocation2 + $0x8] sm:$0xff] %vm1318_vm6, %v1315_v6 }
 0xb58   : > { %1441 = vadd.xlane.f32.xlu0 %v1440_v8  ;;  %v1659_v8 = vsub.s32 4, %v3190_v26 }
 0xb6e   : > { %1449 = vrot.lane.b32.xlu0 %v3204_v47, %s2800_s11 }
 0xb72   : > { %1312 = vrot.lane.b32.xlu0 %v1256_v33, %s2802_s21 }
 0xbe1   : > { %v1439_v9 = vpop.xlane.xlu0 %1438 }
 0xbe2   : > { %2468 = vrcp.f32 %v1439_v9 }
 0xbe5   : > { %v1442_v10 = vpop.xlane.xlu0 %1441 }
 0xbe6   : > { %2470 = vrcp.f32 %v1442_v10 }
 0xbe9   : > { %v1450_v11 = vpop.permute.xlu0 %1449 }
 0xbea   : > { %v1455_v12 = vsel %vm757_vm4, %v1450_v11, 0 }
 0xbeb   : > { %2248 = vmatpush3.bf16.msra.mxu1 %v1455_v12  ;;  %v1660_v12 = vrot.slane %v3194_v28, %v1659_v8 }
 0xbec   : > { %v2469_v13 = vpop.eup %2468  ;;  %2259 = vmatprep.subr.bf16.mxu1 %v2787_v17 }
 0xbed   : > { %v1445_v14 = vmul.f32 %v2469_v13, %v2465_v1  ;;  %v1313_v15 = vpop.permute.xlu0 %1312  ;;  %v1653_v1 = vsub.s32 3, %v3190_v26 }
 0xbee   : > { %1319 = vst.msk [vmem:[#allocation2] sm:$0xff] %vm1318_vm6, %v1313_v15 }
 0xbef   : > { %v1447_v16 = vpack.c.bf16 %v1445_v14, %v1445_v14 }
 0xbf0   : > { %v2471_v47 = vpop.eup %2470 }
 0xbf1   : > { %v1446_v18 = vmul.f32 %v2471_v47, %v2467_v5  ;;  %2250 = vmatmul.mubr.msk.bf16.vlgmr.msra.gmra.mrb[24].mxu1 %vm618_vm3, %v1447_v16  ;;  %v1654_v5 = vrot.slane %v3194_v28, %v1653_v1  ;;  %v2428_v47 = vld [vmem:[%s3161_s22] sm:$0xff]  }
 0xbf2   : > { %2263 = vmatprep.mubr.msk.bf16.mxu1 %vm2788_vm2, %v2787_v17  ;;  %2260 = vmatpush3.bf16.msra.mxu1 %v2424_v20  ;;  %v2431_v20 = vld [vmem:[%s3161_s22 + $0x18] sm:$0xff]  }
 0xbf3   : > { %v1448_v19 = vpack.c.bf16 %v1446_v18, %v1446_v18  ;;  %2261 = vmatprep.subr.bf16.mxu1 %v2787_v17  ;;  %v2429_v18 = vld [vmem:[%s3161_s22 + $0x8] sm:$0xff]  }
 0xbf5   : > { %2256 = vmatmul.mubr.msk.bf16.vlgmr.msra.gmra.mrb[36].mxu0 %vm618_vm3, %v1448_v19  ;;  %v2430_v19 = vld [vmem:[%s3161_s22 + $0x10] sm:$0xff]  }
 0xbf6   : > { %2271 = vmatprep.mubr.msk.bf16.mxu0 %vm2788_vm2, %v2787_v17  ;;  %2262 = vmatpush3.bf16.msra.mxu1 %v2425_v21  ;;  %v2432_v21 = vld [vmem:[%s3161_s22 + $0x20] sm:$0xff]  }
 0xbf7   : > { %2275 = vmatprep.subr.bf16.mxu1 %v2787_v17  ;;  %2268 = vmatpush3.bf16.msra.mxu0 %v2426_v7 }
 0xbf8   : > { %2269 = vmatprep.subr.bf16.mxu0 %v2787_v17 }
 0xbfb   : > { %2270 = vmatpush3.bf16.msra.mxu0 %v2427_v61 }
 0xcc4   : > { %v1491_v22 = vpop.f32.mrb[24].mxu1 }
 0xcc5   : > { %1547 = vrot.lane.b32.xlu0 %v1491_v22, %s2803_s10  ;;  %v2251_v23 = vpop.f32.mrb[25].mxu1  ;;  %v2433_v22 = vld [vmem:[%s3161_s22 + $0x28] sm:$0xff]  }
 0xcc6   : > { %v1494_v24 = vpop.f32.mrb[26].mxu1  ;;  %v2434_v23 = vld [vmem:[%s3161_s22 + $0x30] sm:$0xff]  }
 0xcc7   : > { %v2252_v25 = vpop.f32.mrb[27].mxu1  ;;  %v2435_v24 = vld [vmem:[%s3161_s22 + $0x38] sm:$0xff]  }
 0xcc8   : > { %v1539_v27 = vpop.f32.mrb[36].mxu0  ;;  %v1670_v25 = vsub.s32 7, %v3190_v26 }
 0xcc9   : > { %1549 = vrot.lane.b32.xlu1 %v1539_v27, %s2803_s10  ;;  %v2257_v29 = vpop.f32.mrb[37].mxu0 }
 0xcca   : > { %v1542_v30 = vpop.f32.mrb[38].mxu0  ;;  %v1671_v27 = vrot.slane %v3194_v28, %v1670_v25 }
 0xccb   : > { %v2258_v31 = vpop.f32.mrb[39].mxu0 }
 0xd37   : > { %v1548_v32 = vpop.permute.xlu0 %1547 }
 0xd38   : > { %1554 = vst.msk [vmem:[#allocation2] sm:$0xff] %vm1553_vm7, %v1548_v32 }
 0xd3b   : > { %v1550_v33 = vpop.permute.xlu1 %1549 }
 0xd3c   : > { %1555 = vst.msk [vmem:[#allocation2 + $0x8] sm:$0xff] %vm1553_vm7, %v1550_v33 }
 0xd3f   : > { %v1556_v34 = vld [vmem:[#allocation2] sm:$0xff] }
 0xd43   : > { %v1557_v35 = vld [vmem:[#allocation2 + $0x8] sm:$0xff] }
 0xd44   : > { %v1558_v36 = vpack.c.bf16 %v1557_v35, %v1556_v34 }
 0xd46   : > { %2264 = vmatmul.mubr.msk.bf16.vlgmr.msra.gmra.mrb[28].mxu1 %vm506_vm1, %v1558_v36 }
 0xd47   : > { %2291 = vmatprep.mubr.msk.bf16.mxu1 %vm2788_vm2, %v2787_v17  ;;  %2276 = vmatpush3.bf16.msra.mxu1 %v2428_v47 }
 0xd48   : > { %2277 = vmatprep.subr.bf16.mxu1 %v2787_v17 }
 0xd4b   : > { %2278 = vmatpush3.bf16.msra.mxu1 %v2429_v18 }
 0xd4c   : > { %2279 = vmatprep.subr.bf16.mxu1 %v2787_v17 }
 0xd4f   : > { %2280 = vmatpush3.bf16.msra.mxu1 %v2430_v19 }
 0xd50   : > { %2281 = vmatprep.subr.bf16.mxu1 %v2787_v17 }
 0xd53   : > { %2282 = vmatpush3.bf16.msra.mxu1 %v2431_v20 }
 0xd54   : > { %2283 = vmatprep.subr.bf16.mxu1 %v2787_v17 }
 0xd57   : > { %2284 = vmatpush3.bf16.msra.mxu1 %v2432_v21 }
 0xd58   : > { %2285 = vmatprep.subr.bf16.mxu1 %v2787_v17 }
 0xd5b   : > { %2286 = vmatpush3.bf16.msra.mxu1 %v2433_v22 }
 0xd5c   : > { %2287 = vmatprep.subr.bf16.mxu1 %v2787_v17 }
 0xd5f   : > { %2288 = vmatpush3.bf16.msra.mxu1 %v2434_v23 }
 0xd60   : > { %2289 = vmatprep.subr.bf16.mxu1 %v2787_v17 }
 0xd63   : > { %2290 = vmatpush3.bf16.msra.mxu1 %v2435_v24 }
 0xe19   : > { %v1616_v40 = vpop.f32.mrb[28].mxu1 }
 0xe1a   : > { %v1617_v41 = vadd.f32 %v1616_v40, %v1566_v39  ;;  %v2265_v43 = vpop.f32.mrb[29].mxu1 }
 0xe1b   : > { %v1619_v44 = vpop.f32.mrb[30].mxu1 }
 0xe1c   : > { %v3366_v45 = vadd.f32 %v1617_v41, %v3166_v2  ;;  %v1620_v46 = vadd.f32 %v1619_v44, %v1566_v39  ;;  %v2266_v48 = vpop.f32.mrb[31].mxu1 }
 0xe1e   : > { %v3369_v49 = vadd.f32 %v1620_v46, %v3168_v3  ;;  %v1625_v51 = vsel %vm506_vm1, %v3366_v45, 0.0 }
 0xe1f   : > { %1626 = vadd.xlane.f32.xlu0 %v1625_v51 }
 0xe20   : > { %v1628_v52 = vsel %vm506_vm1, %v3369_v49, 0.0 }
 0xe21   : > { %1629 = vadd.xlane.f32.xlu1 %v1628_v52 }
 0xeac   : > { %v1627_v53 = vpop.xlane.xlu0 %1626 }
 0xead   : > { %v1631_v54 = vmul.f32 0.03125, %v1627_v53 }
 0xeae   : > { %v1630_v55 = vpop.xlane.xlu1 %1629 }
 0xeaf   : > { %v1633_v2 = vsub.f32 %v3366_v45, %v1631_v54  ;;  %v1632_v56 = vmul.f32 0.03125, %v1630_v55 }
 0xeb1   : > { %v1634_v57 = vsub.f32 %v3369_v49, %v1632_v56  ;;  %v1635_v3 = vmul.f32 %v1633_v2, %v1633_v2 }
 0xeb3   : > { %v1637_v58 = vsel %vm506_vm1, %v1635_v3, 0.0  ;;  %v1636_v59 = vmul.f32 %v1634_v57, %v1634_v57  ;;  %v1765_v3 = vsub.s32 5, %v3190_v26 }
 0xeb4   : > { %1638 = vadd.xlane.f32.xlu0 %v1637_v58 }
 0xeb5   : > { %v1640_v60 = vsel %vm506_vm1, %v1636_v59, 0.0  ;;  %v1766_v58 = vrot.slane %v3194_v28, %v1765_v3 }
 0xeb8   : > { %1641 = vadd.xlane.f32.xlu0 %v1640_v60 }
 0xf41   : > { %v1639_v62 = vpop.xlane.xlu0 %1638 }
 0xf42   : > { %v1643_v63 = vmul.f32 0.03125, %v1639_v62 }
 0xf44   : > { %v1645_v0 = vadd.f32 1e-12, %v1643_v63 }
 0xf45   : > { %v1642_v50 = vpop.xlane.xlu0 %1641 }
 0xf46   : > { %2472 = vrsqrt.f32 %v1645_v0  ;;  %v1644_v38 = vmul.f32 0.03125, %v1642_v50 }
 0xf48   : > { %v1646_v42 = vadd.f32 1e-12, %v1644_v38 }
 0xf4a   : > { %2474 = vrsqrt.f32 %v1646_v42 }
 0xf50   : > { %v2473_v4 = vpop.eup %2472 }
 0xf51   : > { %v1649_v6 = vmul.f32 %v2473_v4, %v1633_v2 }
 0xf53   : > { %v1655_v10 = vmul.f32 %v1654_v5, %v1649_v6 }
 0xf54   : > { %v2475_v9 = vpop.eup %2474 }
 0xf55   : > { %v1650_v11 = vmul.f32 %v2475_v9, %v1634_v57  ;;  %v1661_v14 = vadd.f32 %v1660_v12, %v1655_v10 }
 0xf57   : > { %v1656_v13 = vmul.f32 %v1654_v5, %v1650_v11 }
 0xf59   : > { %v1662_v15 = vadd.f32 %v1660_v12, %v1656_v13 }
 0xf5b   : > { %v1663_v16 = vpack.c.bf16 %v1662_v15, %v1661_v14 }
 0xf5d   : > { %2272 = vmatmul.mubr.msk.bf16.vlgmr.msra.gmra.mrb[40].mxu0 %vm506_vm1, %v1663_v16 }
0x1030   : > { %v1721_v29 = vpop.f32.mrb[40].mxu0 }
0x1031   : > { %v1722_v30 = vadd.f32 %v1721_v29, %v1671_v27  ;;  %v2273_v31 = vpop.f32.mrb[41].mxu0 }
0x1032   : > { %v1724_v32 = vpop.f32.mrb[42].mxu0 }
0x1033   : > { %v1730_v33 = vmul.f32 %v1722_v30, %v1722_v30  ;;  %v1725_v34 = vadd.f32 %v1724_v32, %v1671_v27  ;;  %v2274_v35 = vpop.f32.mrb[43].mxu0  ;;  %v1728_v53 = vmul.f32 0.5, %v1722_v30 }
0x1035   : > { %v1732_v36 = vmul.f32 %v1730_v33, %v1722_v30  ;;  %v1731_v37 = vmul.f32 %v1725_v34, %v1725_v34  ;;  %v1729_v54 = vmul.f32 0.5, %v1725_v34 }
0x1037   : > { %v1734_v39 = vmul.f32 0.044715, %v1732_v36  ;;  %v1733_v40 = vmul.f32 %v1731_v37, %v1725_v34 }
0x1039   : > { %v1736_v41 = vadd.f32 %v1734_v39, %v1722_v30  ;;  %v1735_v43 = vmul.f32 0.044715, %v1733_v40 }
0x103b   : > { %v1738_v44 = vmul.f32 0.7978846, %v1736_v41  ;;  %v1737_v17 = vadd.f32 %v1735_v43, %v1725_v34 }
0x103d   : > { %2476 = vtanh.f32 %v1738_v44  ;;  %v1739_v46 = vmul.f32 0.7978846, %v1737_v17 }
0x103f   : > { %2478 = vtanh.f32 %v1739_v46 }
0x1047   : > { %v2477_v48 = vpop.eup %2476 }
0x1048   : > { %v1742_v51 = vadd.f32 1.0, %v2477_v48 }
0x1049   : > { %v2479_v52 = vpop.eup %2478 }
0x104a   : > { %v1743_v55 = vadd.f32 1.0, %v2479_v52  ;;  %v1744_v2 = vmul.f32 %v1742_v51, %v1728_v53 }
0x104c   : > { %v1745_v56 = vmul.f32 %v1743_v55, %v1729_v54 }
0x104e   : > { %v1746_v57 = vpack.c.bf16 %v1745_v56, %v1744_v2 }
0x1050   : > { %2292 = vmatmul.mubr.bf16.vlgmr.msra.gmra.mrb[32].mxu1 %v1746_v57 }
0x1123   : > { %v1849_v59 = vpop.f32.mrb[32].mxu1 }
0x1124   : > { %v1850_v60 = vadd.f32 %v1849_v59, %v1766_v58  ;;  %v2293_v7 = vpop.f32.mrb[33].mxu1 }
0x1125   : > { %v1852_v61 = vpop.f32.mrb[34].mxu1 }
0x1126   : > { %v1856_v62 = vadd.f32 %v1850_v60, %v3366_v45  ;;  %v1853_v63 = vadd.f32 %v1852_v61, %v1766_v58  ;;  %v2294_v0 = vpop.f32.mrb[35].mxu1 }
0x1128   : > { %1858 = vst.msk [vmem:[#allocation13] sm:$0xff] %vm506_vm1, %v1856_v62  ;;  %v1857_v50 = vadd.f32 %v1853_v63, %v3369_v49 }
0x112a   : > { %1859 = vst.msk [vmem:[#allocation13 + $0x8] sm:$0xff] %vm506_vm1, %v1857_v50 }
0x112b   : > { %2699 = shalt.err (!%p2696_p9)
}
0x112c   : > { %s2700_s24 = scalar_lea.hbm %s3461_s7, 256 }
0x112d   : > { %p2701_p10 = scmp.ne.s32.totalorder %s3461_s7, %s2700_s24  ;;  %p2706_p8 = scmp.lt.u32.totalorder %s2700_s24, %s3461_s7 }
0x112f   : > { %p2702_p13 = pnand %p2701_p10, %p2345_p5 }
0x1131   : > { %p2703_p6 = pneg %p2702_p13 }
0x1133   : > { %p2708_p3 = pnand %p2706_p8, %p2703_p6 }
0x1135   : > { %2711 = shalt.err (!%p2708_p3)
}
0x1136   : > { %s2805_s13 = smov 128  }
0x1137   : > { %2314 = dma.vmem_to_hbm [thread:$0]  (%p2345_p5), %s1870_s17, 256, %s3461_s7, [#allocation5], %s2805_s13, %s2805_s13, %s2801_s14  }
0x1138   : > { %2749 = dma.done.wait (%p2345_p5), [#allocation5], 256  }
0x1139   : > { %2751 = vsyncadd (%p2345_p5), [#allocation5], 4294967040 }
0x113a PF: > { %s20_s29 = sadd.s32 1, %s2774_s29   ;;  %s3504_s3 = sld [smem:[#allocation18_spill]] }
0x113b   : > { %p17_p1 = scmp.ge.s32.totalorder %s20_s29, 4   ;;  %s3505_s26 = sld [smem:[#allocation20_spill]] }
0x113c   : > { %s3506_s12 = sld [smem:[#allocation19_spill]]  ;;  %s3507_s24 = smov %s2758_s25 }
0x113d   : > { %s3509_s27 = smov %s2770_s28  ;;  %19 = sbr.rel (!%p17_p1) target bundleno = 9 (0x9), region = 143 }
0x1140   : > { %s3508_s25 = smov %s3504_s3 }
0x1142   : > { %s3510_s28 = smov %s3506_s12 }
0x1144   :  { %1885 = vsyncpa [#allocation4], 1 }
0x1145   :  { %1887 = vsyncpa [#allocation4 + $0x1], 1 }
0x1146   :  { %1888 = vsyncpa [#allocation7], 1 }
0x1147   :  { %1889 = vsyncpa [#allocation5], 1 }
0x1148   :  { %1891 = vsyncpa [#allocation5 + $0x1], 1 }

</bundles_post_ra>
